<compile_context>
chip_gen: v5e
topology: v5e:2x2
jax: 0.10.0
libtpu: 0.0.40
codegen_flags: <defaults>
</compile_context>

<pallas_src>
import functools

import jax
import jax.numpy as jnp
import numpy as np
from jax.experimental import pallas as pl
from jax.experimental.pallas import tpu as pltpu


def _align8(n):
    return ((n + 7) // 8) * 8


def generator_forward_kernel(ids_ref, slab32_ref, slab96_ref, slab128_ref, h0_ref,
                             logp_ref, hN_ref, hbuf_ref, *, B, L, V, H):
    f32 = jnp.float32
    LB = L * B
    V3 = 3 * V

    # ---------- static views into the packed weight slabs (one-time loads) ----------
    o_w2 = _align8(V3)
    o_b = _align8(o_w2 + 3 * H)
    w1e = slab32_ref[0:V3, :]                   # (3V, H)  fused embedding+conv1, taps [t-1, t, t+1]
    w2 = slab32_ref[o_w2:o_w2 + 3 * H, :]       # (3H, H)  conv2 im2col weight
    b1 = slab32_ref[o_b:o_b + 1, :]             # (1, H)
    b2 = slab32_ref[o_b + 1:o_b + 2, :]         # (1, H)
    bhh_n = slab32_ref[o_b + 2:o_b + 3, :]      # (1, H)
    wih = slab96_ref[0:H, :]                    # (H, 3H)  packed gates r|z|n
    whh = slab96_ref[H:2 * H, :]                # (H, 3H)
    bih = slab96_ref[2 * H:2 * H + 1, :]        # (1, 3H)  bhh_r, bhh_z already folded in
    wo = slab128_ref[0:H, :]                    # (H, 128) zero-padded past V
    bo = slab128_ref[H:H + 1, :]                # (1, 128) -1e30 past V

    # ---------- fused embedding + conv1 (k=3, pad=1): shifted one-hot, one matmul ----------
    ids = ids_ref[...]                                                  # (LB, 1) int32, row = t*B + b
    neg = jnp.full((B, 1), -1, jnp.int32)                               # sentinel: matches no column
    ids_prev = jnp.concatenate([neg, ids[:LB - B]], axis=0)             # id at t-1 -> cols [0, V)
    ids_cur = ids + V                                                   # id at t   -> cols [V, 2V)
    ids_next = jnp.concatenate([ids[B:] + 2 * V, neg], axis=0)          # id at t+1 -> cols [2V, 3V)
    col = jax.lax.broadcasted_iota(jnp.int32, (LB, V3), 1)
    oh3 = ((col == ids_prev) | (col == ids_cur) | (col == ids_next)).astype(f32)
    h1 = jnp.maximum(jnp.dot(oh3, w1e, preferred_element_type=f32) + b1, 0.0)          # (LB, H)

    # ---------- conv2 (k=3, pad=1): im2col via register row-shifts, one matmul ----------
    zrow = jnp.zeros((B, H), f32)
    hcol = jnp.concatenate([
        jnp.concatenate([zrow, h1[:LB - B]], axis=0),       # tap t-1
        h1,                                                 # tap t
        jnp.concatenate([h1[B:], zrow], axis=0),            # tap t+1
    ], axis=-1)                                                                          # (LB, 3H)
    conv = jnp.maximum(jnp.dot(hcol, w2, preferred_element_type=f32) + b2, 0.0)          # (LB, H)

    # ---------- GRU: hoisted packed i2h matmul, one packed h2h matmul per step ----------
    gi = jnp.dot(conv, wih, preferred_element_type=f32) + bih                            # (LB, 3H)

    h = h0_ref[...].astype(f32)                                                          # (B, H)
    for t in range(L):                    # static unroll; only gh depends on h
        gh = jnp.dot(h, whh, preferred_element_type=f32)                                 # (B, 3H)
        gi_t = gi[t * B:(t + 1) * B, :]                                                  # static rows
        r = jax.nn.sigmoid(gi_t[:, 0:H] + gh[:, 0:H])
        z = jax.nn.sigmoid(gi_t[:, H:2 * H] + gh[:, H:2 * H])
        n = jnp.tanh(gi_t[:, 2 * H:3 * H] + r * (gh[:, 2 * H:3 * H] + bhh_n))
        h = (1.0 - z) * n + z * h
        hbuf_ref[t * B:(t + 1) * B, :] = h
    hN_ref[...] = h

    # ---------- output projection + log_softmax, single lane-dense (LB, 128) store ----------
    logits = jnp.dot(hbuf_ref[...], wo, preferred_element_type=f32) + bo                 # (LB, 128)
    m = jnp.max(logits, axis=1, keepdims=True)
    lse = m + jnp.log(jnp.sum(jnp.exp(logits - m), axis=1, keepdims=True))
    logp_ref[...] = logits - lse


def generator_forward(inp, hidden, params):
    """inp: (B, L) int32 token ids; hidden: (1, B, H) float32."""
    f32 = jnp.float32
    B, L = inp.shape
    V, E = params['emb'].shape
    H = params['b1'].shape[1]
    VP = ((V + 127) // 128) * 128          # lane-dense padded vocab width
    NEG = -1e30

    # time-major token ids: row index = t*B + b (matches out.view(-1, H) ordering)
    ids_tm = jnp.transpose(inp).reshape(L * B, 1).astype(jnp.int32)
    h0 = hidden[0].astype(f32)

    # ----- constant-folded weight re-layouts / packing (params are jit constants) -----
    # fused embedding+conv1 weight: block k maps one-hot(token at t-1+k) -> conv1 contribution
    w1e = jnp.concatenate([params['emb'] @ params['w1'][k] for k in range(3)], axis=0)   # (3V, H)
    w2col = params['w2'].reshape(3 * H, H)                                               # (3H, H)
    # fold bhh_r, bhh_z into the hoisted input-to-hidden bias (bhh_n must stay inside r*(.))
    bih_comb = params['bih'] + jnp.concatenate(
        [params['bhh'][:, :2 * H], jnp.zeros((1, H), f32)], axis=1)                      # (1, 3H)
    bhh_n = params['bhh'][:, 2 * H:]                                                     # (1, H)

    # slab of lane-width H operands (conv weights + small biases)
    o_w2 = _align8(3 * V)
    o_b = _align8(o_w2 + 3 * H)
    slab32 = jnp.zeros((_align8(o_b + 3), H), f32)
    slab32 = slab32.at[0:3 * V].set(w1e)
    slab32 = slab32.at[o_w2:o_w2 + 3 * H].set(w2col)
    slab32 = slab32.at[o_b].set(params['b1'][0])
    slab32 = slab32.at[o_b + 1].set(params['b2'][0])
    slab32 = slab32.at[o_b + 2].set(bhh_n[0])

    # slab of lane-width 3H operands (GRU, gate order r|z|n)
    slab96 = jnp.zeros((_align8(2 * H + 1), 3 * H), f32)
    slab96 = slab96.at[0:H].set(params['wih'])
    slab96 = slab96.at[H:2 * H].set(params['whh'])
    slab96 = slab96.at[2 * H].set(bih_comb[0])

    # slab of lane-width 128 operands (output head); wo zero-padded, bo -> -1e30 past V
    slab128 = jnp.zeros((_align8(H + 1), VP), f32)
    slab128 = slab128.at[0:H, 0:V].set(params['wo'])
    slab128 = slab128.at[H, :].set(NEG)
    slab128 = slab128.at[H, 0:V].set(params['bo'][0])

    vmem = pl.BlockSpec(memory_space=pltpu.MemorySpace.VMEM)
    logp_p, hN = pl.pallas_call(
        functools.partial(generator_forward_kernel, B=B, L=L, V=V, H=H),
        out_shape=(jax.ShapeDtypeStruct((L * B, VP), f32),
                   jax.ShapeDtypeStruct((B, H), f32)),
        in_specs=[vmem] * 5,
        out_specs=(vmem, vmem),
        scratch_shapes=[pltpu.VMEM((L * B, H), f32)],
    )(ids_tm, slab32, slab96, slab128, h0)
    return logp_p[:, :V], hN[None, :, :]


def reference_forward(inp, hidden, params):
    """Pure-JAX reference matching the PyTorch module semantics."""
    B, L = inp.shape
    H = params['b1'].shape[1]
    emb = jnp.take(params['emb'], inp, axis=0)
    xp = jnp.pad(emb, ((0, 0), (1, 1), (0, 0)))
    h1 = jnp.zeros((B, L, H), jnp.float32) + params['b1']
    for k in range(3):
        h1 = h1 + jnp.einsum('ble,eh->blh', xp[:, k:k + L, :], params['w1'][k])
    h1 = jax.nn.relu(h1)
    h1p = jnp.pad(h1, ((0, 0), (1, 1), (0, 0)))
    h2 = jnp.zeros((B, L, H), jnp.float32) + params['b2']
    for k in range(3):
        h2 = h2 + jnp.einsum('blh,hg->blg', h1p[:, k:k + L, :], params['w2'][k])
    h2 = jax.nn.relu(h2)

    h = hidden[0]
    outs = []
    for t in range(L):
        x_t = h2[:, t, :]
        gi = x_t @ params['wih'] + params['bih']
        gh = h @ params['whh'] + params['bhh']
        r = jax.nn.sigmoid(gi[:, :H] + gh[:, :H])
        z = jax.nn.sigmoid(gi[:, H:2 * H] + gh[:, H:2 * H])
        n = jnp.tanh(gi[:, 2 * H:] + r * gh[:, 2 * H:])
        h = (1.0 - z) * n + z * h
        outs.append(h)
    out = jnp.stack(outs, axis=0).reshape(L * B, H)
    logits = out @ params['wo'] + params['bo']
    return jax.nn.log_softmax(logits, axis=1), h[None]


if __name__ == "__main__":
    # Small shapes consistent with the module: batch=2, seq=8,
    # embedding_dim=32, hidden_dim=32, vocab_size=22 (chars 1..21 + pad 0).
    B, L = 2, 8
    E, H, V = 32, 32, 22

    key = jax.random.PRNGKey(0)
    ks = jax.random.split(key, 14)
    s = 0.1
    params = {
        'emb': (jax.random.normal(ks[0], (V, E)) * s).astype(jnp.float32),
        'w1':  (jax.random.normal(ks[1], (3, E, H)) * s).astype(jnp.float32),   # conv1 weight (tap, in, out)
        'b1':  (jax.random.normal(ks[2], (1, H)) * s).astype(jnp.float32),
        'w2':  (jax.random.normal(ks[3], (3, H, H)) * s).astype(jnp.float32),   # conv2 weight
        'b2':  (jax.random.normal(ks[4], (1, H)) * s).astype(jnp.float32),
        'wih': (jax.random.normal(ks[5], (H, 3 * H)) * s).astype(jnp.float32),  # GRU W_ih^T (gates r,z,n)
        'whh': (jax.random.normal(ks[6], (H, 3 * H)) * s).astype(jnp.float32),  # GRU W_hh^T
        'bih': (jax.random.normal(ks[7], (1, 3 * H)) * s).astype(jnp.float32),
        'bhh': (jax.random.normal(ks[8], (1, 3 * H)) * s).astype(jnp.float32),
        'wo':  (jax.random.normal(ks[9], (H, V)) * s).astype(jnp.float32),      # gru2out weight^T
        'bo':  (jax.random.normal(ks[10], (1, V)) * s).astype(jnp.float32),
    }

    inp = jax.random.randint(ks[11], (B, L), 0, V, dtype=jnp.int32)
    hidden = jnp.zeros((1, B, H), jnp.float32)

    fwd = jax.jit(functools.partial(generator_forward, params=params))
    logp, hN = fwd(inp, hidden)
    jax.block_until_ready((logp, hN))

    logp_ref, hN_ref = reference_forward(inp, hidden, params)
    np.testing.assert_allclose(np.asarray(logp), np.asarray(logp_ref),
                               rtol=1e-4, atol=1e-4)
    np.testing.assert_allclose(np.asarray(hN), np.asarray(hN_ref),
                               rtol=1e-4, atol=1e-4)
    print("KERNEL_OK")
</pallas_src>

<mosaic_0001>
module attributes {stable_mosaic.version = 11 : i64} {
  func.func @generator_forward_kernel(%arg0: memref<16x1xi32, #tpu.memory_space<vmem>>, %arg1: memref<176x32xf32, #tpu.memory_space<vmem>>, %arg2: memref<72x96xf32, #tpu.memory_space<vmem>>, %arg3: memref<40x128xf32, #tpu.memory_space<vmem>>, %arg4: memref<2x32xf32, #tpu.memory_space<vmem>>, %arg5: memref<16x128xf32, #tpu.memory_space<vmem>>, %arg6: memref<2x32xf32, #tpu.memory_space<vmem>>, %arg7: memref<16x32xf32, #tpu.memory_space<vmem>>) attributes {dimension_semantics = [], scalar_prefetch = 0 : i64, scratch_operands = 1 : i64, tpu.core_type = #tpu.core_type<tc>} {
    %c0 = arith.constant 0 : index
    %c0_0 = arith.constant 0 : index
    %0 = vector.load %arg1[%c0, %c0_0] : memref<176x32xf32, #tpu.memory_space<vmem>>, vector<66x32xf32>
    %c72 = arith.constant 72 : index
    %c0_1 = arith.constant 0 : index
    %1 = vector.load %arg1[%c72, %c0_1] : memref<176x32xf32, #tpu.memory_space<vmem>>, vector<96x32xf32>
    %c168 = arith.constant 168 : index
    %c0_2 = arith.constant 0 : index
    %2 = vector.load %arg1[%c168, %c0_2] : memref<176x32xf32, #tpu.memory_space<vmem>>, vector<1x32xf32>
    %c169 = arith.constant 169 : index
    %c0_3 = arith.constant 0 : index
    %3 = vector.load %arg1[%c169, %c0_3] : memref<176x32xf32, #tpu.memory_space<vmem>>, vector<1x32xf32>
    %c170 = arith.constant 170 : index
    %c0_4 = arith.constant 0 : index
    %4 = vector.load %arg1[%c170, %c0_4] : memref<176x32xf32, #tpu.memory_space<vmem>>, vector<1x32xf32>
    %c0_5 = arith.constant 0 : index
    %c0_6 = arith.constant 0 : index
    %5 = vector.load %arg2[%c0_5, %c0_6] : memref<72x96xf32, #tpu.memory_space<vmem>>, vector<32x96xf32>
    %c32 = arith.constant 32 : index
    %c0_7 = arith.constant 0 : index
    %6 = vector.load %arg2[%c32, %c0_7] : memref<72x96xf32, #tpu.memory_space<vmem>>, vector<32x96xf32>
    %c64 = arith.constant 64 : index
    %c0_8 = arith.constant 0 : index
    %7 = vector.load %arg2[%c64, %c0_8] : memref<72x96xf32, #tpu.memory_space<vmem>>, vector<1x96xf32>
    %c0_9 = arith.constant 0 : index
    %c0_10 = arith.constant 0 : index
    %8 = vector.load %arg3[%c0_9, %c0_10] : memref<40x128xf32, #tpu.memory_space<vmem>>, vector<32x128xf32>
    %c32_11 = arith.constant 32 : index
    %c0_12 = arith.constant 0 : index
    %9 = vector.load %arg3[%c32_11, %c0_12] : memref<40x128xf32, #tpu.memory_space<vmem>>, vector<1x128xf32>
    %c0_13 = arith.constant 0 : index
    %c0_14 = arith.constant 0 : index
    %10 = vector.load %arg0[%c0_13, %c0_14] : memref<16x1xi32, #tpu.memory_space<vmem>>, vector<16x1xi32>
    %c-1_i32 = arith.constant -1 : i32
    %11 = vector.broadcast %c-1_i32 : i32 to vector<2x1xi32>
    %12 = vector.extract_strided_slice %10 {offsets = [0, 0], sizes = [14, 1], strides = [1, 1]} : vector<16x1xi32> to vector<14x1xi32>
    %13 = tpu.concatenate %11, %12 in 0 : vector<2x1xi32>, vector<14x1xi32> -> vector<16x1xi32>
    %c22_i32 = arith.constant 22 : i32
    %14 = vector.broadcast %c22_i32 : i32 to vector<16x1xi32>
    %15 = arith.addi %10, %14 : vector<16x1xi32>
    %16 = vector.extract_strided_slice %10 {offsets = [2, 0], sizes = [14, 1], strides = [1, 1]} : vector<16x1xi32> to vector<14x1xi32>
    %c44_i32 = arith.constant 44 : i32
    %17 = vector.broadcast %c44_i32 : i32 to vector<14x1xi32>
    %18 = arith.addi %16, %17 : vector<14x1xi32>
    %19 = tpu.concatenate %18, %11 in 0 : vector<14x1xi32>, vector<2x1xi32> -> vector<16x1xi32>
    %20 = tpu.iota {dimensions = array<i32: 1>} : vector<16x66xi32>
    %21 = vector.broadcast %13 : vector<16x1xi32> to vector<16x66xi32>
    %22 = arith.cmpi eq, %20, %21 : vector<16x66xi32>
    %23 = vector.broadcast %15 : vector<16x1xi32> to vector<16x66xi32>
    %24 = arith.cmpi eq, %20, %23 : vector<16x66xi32>
    %25 = arith.ori %22, %24 : vector<16x66xi1>
    %26 = vector.broadcast %19 : vector<16x1xi32> to vector<16x66xi32>
    %27 = arith.cmpi eq, %20, %26 : vector<16x66xi32>
    %28 = arith.ori %25, %27 : vector<16x66xi1>
    %29 = arith.extui %28 : vector<16x66xi1> to vector<16x66xi32>
    %30 = arith.sitofp %29 : vector<16x66xi32> to vector<16x66xf32>
    %cst = arith.constant dense<0.000000e+00> : vector<16x32xf32>
    %31 = tpu.matmul %30, %0, %cst {dimension_numbers = #tpu.dot_dimension_numbers<[1], [0], [0], [1], [0, 0, 1, 1], [], []>} : vector<16x66xf32>, vector<66x32xf32>, vector<16x32xf32> -> vector<16x32xf32>
    %32 = vector.broadcast %2 : vector<1x32xf32> to vector<16x32xf32>
    %33 = arith.addf %31, %32 : vector<16x32xf32>
    %cst_15 = arith.constant 0.000000e+00 : f32
    %34 = vector.broadcast %cst_15 : f32 to vector<16x32xf32>
    %35 = arith.maximumf %33, %34 : vector<16x32xf32>
    %cst_16 = arith.constant 0.000000e+00 : f32
    %36 = vector.broadcast %cst_16 : f32 to vector<2x32xf32>
    %37 = vector.extract_strided_slice %35 {offsets = [0, 0], sizes = [14, 32], strides = [1, 1]} : vector<16x32xf32> to vector<14x32xf32>
    %38 = tpu.concatenate %36, %37 in 0 : vector<2x32xf32>, vector<14x32xf32> -> vector<16x32xf32>
    %39 = vector.extract_strided_slice %35 {offsets = [2, 0], sizes = [14, 32], strides = [1, 1]} : vector<16x32xf32> to vector<14x32xf32>
    %40 = tpu.concatenate %39, %36 in 0 : vector<14x32xf32>, vector<2x32xf32> -> vector<16x32xf32>
    %41 = tpu.concatenate %38, %35, %40 in 1 : vector<16x32xf32>, vector<16x32xf32>, vector<16x32xf32> -> vector<16x96xf32>
    %cst_17 = arith.constant dense<0.000000e+00> : vector<16x32xf32>
    %42 = tpu.matmul %41, %1, %cst_17 {dimension_numbers = #tpu.dot_dimension_numbers<[1], [0], [0], [1], [0, 0, 1, 1], [], []>} : vector<16x96xf32>, vector<96x32xf32>, vector<16x32xf32> -> vector<16x32xf32>
    %43 = vector.broadcast %3 : vector<1x32xf32> to vector<16x32xf32>
    %44 = arith.addf %42, %43 : vector<16x32xf32>
    %cst_18 = arith.constant 0.000000e+00 : f32
    %45 = vector.broadcast %cst_18 : f32 to vector<16x32xf32>
    %46 = arith.maximumf %44, %45 : vector<16x32xf32>
    %cst_19 = arith.constant dense<0.000000e+00> : vector<16x96xf32>
    %47 = tpu.matmul %46, %5, %cst_19 {dimension_numbers = #tpu.dot_dimension_numbers<[1], [0], [0], [1], [0, 0, 1, 1], [], []>} : vector<16x32xf32>, vector<32x96xf32>, vector<16x96xf32> -> vector<16x96xf32>
    %48 = vector.broadcast %7 : vector<1x96xf32> to vector<16x96xf32>
    %49 = arith.addf %47, %48 : vector<16x96xf32>
    %c0_20 = arith.constant 0 : index
    %c0_21 = arith.constant 0 : index
    %50 = vector.load %arg4[%c0_20, %c0_21] : memref<2x32xf32, #tpu.memory_space<vmem>>, vector<2x32xf32>
    %cst_22 = arith.constant dense<0.000000e+00> : vector<2x96xf32>
    %51 = tpu.matmul %50, %6, %cst_22 {dimension_numbers = #tpu.dot_dimension_numbers<[1], [0], [0], [1], [0, 0, 1, 1], [], []>} : vector<2x32xf32>, vector<32x96xf32>, vector<2x96xf32> -> vector<2x96xf32>
    %52 = vector.extract_strided_slice %49 {offsets = [0, 0], sizes = [2, 96], strides = [1, 1]} : vector<16x96xf32> to vector<2x96xf32>
    %53 = vector.extract_strided_slice %52 {offsets = [0, 0], sizes = [2, 32], strides = [1, 1]} : vector<2x96xf32> to vector<2x32xf32>
    %54 = vector.extract_strided_slice %51 {offsets = [0, 0], sizes = [2, 32], strides = [1, 1]} : vector<2x96xf32> to vector<2x32xf32>
    %55 = arith.addf %53, %54 : vector<2x32xf32>
    %56 = arith.negf %55 : vector<2x32xf32>
    %57 = math.exp %56 : vector<2x32xf32>
    %cst_23 = arith.constant 1.000000e+00 : f32
    %58 = vector.broadcast %cst_23 : f32 to vector<2x32xf32>
    %59 = arith.addf %58, %57 : vector<2x32xf32>
    %60 = arith.divf %58, %59 : vector<2x32xf32>
    %61 = vector.extract_strided_slice %52 {offsets = [0, 32], sizes = [2, 32], strides = [1, 1]} : vector<2x96xf32> to vector<2x32xf32>
    %62 = vector.extract_strided_slice %51 {offsets = [0, 32], sizes = [2, 32], strides = [1, 1]} : vector<2x96xf32> to vector<2x32xf32>
    %63 = arith.addf %61, %62 : vector<2x32xf32>
    %64 = arith.negf %63 : vector<2x32xf32>
    %65 = math.exp %64 : vector<2x32xf32>
    %cst_24 = arith.constant 1.000000e+00 : f32
    %66 = vector.broadcast %cst_24 : f32 to vector<2x32xf32>
    %67 = arith.addf %66, %65 : vector<2x32xf32>
    %68 = arith.divf %66, %67 : vector<2x32xf32>
    %69 = vector.extract_strided_slice %52 {offsets = [0, 64], sizes = [2, 32], strides = [1, 1]} : vector<2x96xf32> to vector<2x32xf32>
    %70 = vector.extract_strided_slice %51 {offsets = [0, 64], sizes = [2, 32], strides = [1, 1]} : vector<2x96xf32> to vector<2x32xf32>
    %71 = vector.broadcast %4 : vector<1x32xf32> to vector<2x32xf32>
    %72 = arith.addf %70, %71 : vector<2x32xf32>
    %73 = arith.mulf %60, %72 : vector<2x32xf32>
    %74 = arith.addf %69, %73 : vector<2x32xf32>
    %75 = math.tanh %74 : vector<2x32xf32>
    %cst_25 = arith.constant 1.000000e+00 : f32
    %76 = vector.broadcast %cst_25 : f32 to vector<2x32xf32>
    %77 = arith.subf %76, %68 : vector<2x32xf32>
    %78 = arith.mulf %77, %75 : vector<2x32xf32>
    %79 = arith.mulf %68, %50 : vector<2x32xf32>
    %80 = arith.addf %78, %79 : vector<2x32xf32>
    %c0_26 = arith.constant 0 : index
    %c0_27 = arith.constant 0 : index
    %81 = vector.load %arg7[%c0_26, %c0_27] : memref<16x32xf32, #tpu.memory_space<vmem>>, vector<2x32xf32>
    tpu.vector_store %arg7[%c0_26, %c0_27], %80 {strides = array<i32>} : memref<16x32xf32, #tpu.memory_space<vmem>>, vector<2x32xf32>,
    %cst_28 = arith.constant dense<0.000000e+00> : vector<2x96xf32>
    %82 = tpu.matmul %80, %6, %cst_28 {dimension_numbers = #tpu.dot_dimension_numbers<[1], [0], [0], [1], [0, 0, 1, 1], [], []>} : vector<2x32xf32>, vector<32x96xf32>, vector<2x96xf32> -> vector<2x96xf32>
    %83 = vector.extract_strided_slice %49 {offsets = [2, 0], sizes = [2, 96], strides = [1, 1]} : vector<16x96xf32> to vector<2x96xf32>
    %84 = vector.extract_strided_slice %83 {offsets = [0, 0], sizes = [2, 32], strides = [1, 1]} : vector<2x96xf32> to vector<2x32xf32>
    %85 = vector.extract_strided_slice %82 {offsets = [0, 0], sizes = [2, 32], strides = [1, 1]} : vector<2x96xf32> to vector<2x32xf32>
    %86 = arith.addf %84, %85 : vector<2x32xf32>
    %87 = arith.negf %86 : vector<2x32xf32>
    %88 = math.exp %87 : vector<2x32xf32>
    %cst_29 = arith.constant 1.000000e+00 : f32
    %89 = vector.broadcast %cst_29 : f32 to vector<2x32xf32>
    %90 = arith.addf %89, %88 : vector<2x32xf32>
    %91 = arith.divf %89, %90 : vector<2x32xf32>
    %92 = vector.extract_strided_slice %83 {offsets = [0, 32], sizes = [2, 32], strides = [1, 1]} : vector<2x96xf32> to vector<2x32xf32>
    %93 = vector.extract_strided_slice %82 {offsets = [0, 32], sizes = [2, 32], strides = [1, 1]} : vector<2x96xf32> to vector<2x32xf32>
    %94 = arith.addf %92, %93 : vector<2x32xf32>
    %95 = arith.negf %94 : vector<2x32xf32>
    %96 = math.exp %95 : vector<2x32xf32>
    %cst_30 = arith.constant 1.000000e+00 : f32
    %97 = vector.broadcast %cst_30 : f32 to vector<2x32xf32>
    %98 = arith.addf %97, %96 : vector<2x32xf32>
    %99 = arith.divf %97, %98 : vector<2x32xf32>
    %100 = vector.extract_strided_slice %83 {offsets = [0, 64], sizes = [2, 32], strides = [1, 1]} : vector<2x96xf32> to vector<2x32xf32>
    %101 = vector.extract_strided_slice %82 {offsets = [0, 64], sizes = [2, 32], strides = [1, 1]} : vector<2x96xf32> to vector<2x32xf32>
    %102 = vector.broadcast %4 : vector<1x32xf32> to vector<2x32xf32>
    %103 = arith.addf %101, %102 : vector<2x32xf32>
    %104 = arith.mulf %91, %103 : vector<2x32xf32>
    %105 = arith.addf %100, %104 : vector<2x32xf32>
    %106 = math.tanh %105 : vector<2x32xf32>
    %cst_31 = arith.constant 1.000000e+00 : f32
    %107 = vector.broadcast %cst_31 : f32 to vector<2x32xf32>
    %108 = arith.subf %107, %99 : vector<2x32xf32>
    %109 = arith.mulf %108, %106 : vector<2x32xf32>
    %110 = arith.mulf %99, %80 : vector<2x32xf32>
    %111 = arith.addf %109, %110 : vector<2x32xf32>
    %c2 = arith.constant 2 : index
    %c0_32 = arith.constant 0 : index
    %112 = vector.load %arg7[%c2, %c0_32] : memref<16x32xf32, #tpu.memory_space<vmem>>, vector<2x32xf32>
    tpu.vector_store %arg7[%c2, %c0_32], %111 {strides = array<i32>} : memref<16x32xf32, #tpu.memory_space<vmem>>, vector<2x32xf32>,
    %cst_33 = arith.constant dense<0.000000e+00> : vector<2x96xf32>
    %113 = tpu.matmul %111, %6, %cst_33 {dimension_numbers = #tpu.dot_dimension_numbers<[1], [0], [0], [1], [0, 0, 1, 1], [], []>} : vector<2x32xf32>, vector<32x96xf32>, vector<2x96xf32> -> vector<2x96xf32>
    %114 = vector.extract_strided_slice %49 {offsets = [4, 0], sizes = [2, 96], strides = [1, 1]} : vector<16x96xf32> to vector<2x96xf32>
    %115 = vector.extract_strided_slice %114 {offsets = [0, 0], sizes = [2, 32], strides = [1, 1]} : vector<2x96xf32> to vector<2x32xf32>
    %116 = vector.extract_strided_slice %113 {offsets = [0, 0], sizes = [2, 32], strides = [1, 1]} : vector<2x96xf32> to vector<2x32xf32>
    %117 = arith.addf %115, %116 : vector<2x32xf32>
    %118 = arith.negf %117 : vector<2x32xf32>
    %119 = math.exp %118 : vector<2x32xf32>
    %cst_34 = arith.constant 1.000000e+00 : f32
    %120 = vector.broadcast %cst_34 : f32 to vector<2x32xf32>
    %121 = arith.addf %120, %119 : vector<2x32xf32>
    %122 = arith.divf %120, %121 : vector<2x32xf32>
    %123 = vector.extract_strided_slice %114 {offsets = [0, 32], sizes = [2, 32], strides = [1, 1]} : vector<2x96xf32> to vector<2x32xf32>
    %124 = vector.extract_strided_slice %113 {offsets = [0, 32], sizes = [2, 32], strides = [1, 1]} : vector<2x96xf32> to vector<2x32xf32>
    %125 = arith.addf %123, %124 : vector<2x32xf32>
    %126 = arith.negf %125 : vector<2x32xf32>
    %127 = math.exp %126 : vector<2x32xf32>
    %cst_35 = arith.constant 1.000000e+00 : f32
    %128 = vector.broadcast %cst_35 : f32 to vector<2x32xf32>
    %129 = arith.addf %128, %127 : vector<2x32xf32>
    %130 = arith.divf %128, %129 : vector<2x32xf32>
    %131 = vector.extract_strided_slice %114 {offsets = [0, 64], sizes = [2, 32], strides = [1, 1]} : vector<2x96xf32> to vector<2x32xf32>
    %132 = vector.extract_strided_slice %113 {offsets = [0, 64], sizes = [2, 32], strides = [1, 1]} : vector<2x96xf32> to vector<2x32xf32>
    %133 = vector.broadcast %4 : vector<1x32xf32> to vector<2x32xf32>
    %134 = arith.addf %132, %133 : vector<2x32xf32>
    %135 = arith.mulf %122, %134 : vector<2x32xf32>
    %136 = arith.addf %131, %135 : vector<2x32xf32>
    %137 = math.tanh %136 : vector<2x32xf32>
    %cst_36 = arith.constant 1.000000e+00 : f32
    %138 = vector.broadcast %cst_36 : f32 to vector<2x32xf32>
    %139 = arith.subf %138, %130 : vector<2x32xf32>
    %140 = arith.mulf %139, %137 : vector<2x32xf32>
    %141 = arith.mulf %130, %111 : vector<2x32xf32>
    %142 = arith.addf %140, %141 : vector<2x32xf32>
    %c4 = arith.constant 4 : index
    %c0_37 = arith.constant 0 : index
    %143 = vector.load %arg7[%c4, %c0_37] : memref<16x32xf32, #tpu.memory_space<vmem>>, vector<2x32xf32>
    tpu.vector_store %arg7[%c4, %c0_37], %142 {strides = array<i32>} : memref<16x32xf32, #tpu.memory_space<vmem>>, vector<2x32xf32>,
    %cst_38 = arith.constant dense<0.000000e+00> : vector<2x96xf32>
    %144 = tpu.matmul %142, %6, %cst_38 {dimension_numbers = #tpu.dot_dimension_numbers<[1], [0], [0], [1], [0, 0, 1, 1], [], []>} : vector<2x32xf32>, vector<32x96xf32>, vector<2x96xf32> -> vector<2x96xf32>
    %145 = vector.extract_strided_slice %49 {offsets = [6, 0], sizes = [2, 96], strides = [1, 1]} : vector<16x96xf32> to vector<2x96xf32>
    %146 = vector.extract_strided_slice %145 {offsets = [0, 0], sizes = [2, 32], strides = [1, 1]} : vector<2x96xf32> to vector<2x32xf32>
    %147 = vector.extract_strided_slice %144 {offsets = [0, 0], sizes = [2, 32], strides = [1, 1]} : vector<2x96xf32> to vector<2x32xf32>
    %148 = arith.addf %146, %147 : vector<2x32xf32>
    %149 = arith.negf %148 : vector<2x32xf32>
    %150 = math.exp %149 : vector<2x32xf32>
    %cst_39 = arith.constant 1.000000e+00 : f32
    %151 = vector.broadcast %cst_39 : f32 to vector<2x32xf32>
    %152 = arith.addf %151, %150 : vector<2x32xf32>
    %153 = arith.divf %151, %152 : vector<2x32xf32>
    %154 = vector.extract_strided_slice %145 {offsets = [0, 32], sizes = [2, 32], strides = [1, 1]} : vector<2x96xf32> to vector<2x32xf32>
    %155 = vector.extract_strided_slice %144 {offsets = [0, 32], sizes = [2, 32], strides = [1, 1]} : vector<2x96xf32> to vector<2x32xf32>
    %156 = arith.addf %154, %155 : vector<2x32xf32>
    %157 = arith.negf %156 : vector<2x32xf32>
    %158 = math.exp %157 : vector<2x32xf32>
    %cst_40 = arith.constant 1.000000e+00 : f32
    %159 = vector.broadcast %cst_40 : f32 to vector<2x32xf32>
    %160 = arith.addf %159, %158 : vector<2x32xf32>
    %161 = arith.divf %159, %160 : vector<2x32xf32>
    %162 = vector.extract_strided_slice %145 {offsets = [0, 64], sizes = [2, 32], strides = [1, 1]} : vector<2x96xf32> to vector<2x32xf32>
    %163 = vector.extract_strided_slice %144 {offsets = [0, 64], sizes = [2, 32], strides = [1, 1]} : vector<2x96xf32> to vector<2x32xf32>
    %164 = vector.broadcast %4 : vector<1x32xf32> to vector<2x32xf32>
    %165 = arith.addf %163, %164 : vector<2x32xf32>
    %166 = arith.mulf %153, %165 : vector<2x32xf32>
    %167 = arith.addf %162, %166 : vector<2x32xf32>
    %168 = math.tanh %167 : vector<2x32xf32>
    %cst_41 = arith.constant 1.000000e+00 : f32
    %169 = vector.broadcast %cst_41 : f32 to vector<2x32xf32>
    %170 = arith.subf %169, %161 : vector<2x32xf32>
    %171 = arith.mulf %170, %168 : vector<2x32xf32>
    %172 = arith.mulf %161, %142 : vector<2x32xf32>
    %173 = arith.addf %171, %172 : vector<2x32xf32>
    %c6 = arith.constant 6 : index
    %c0_42 = arith.constant 0 : index
    %174 = vector.load %arg7[%c6, %c0_42] : memref<16x32xf32, #tpu.memory_space<vmem>>, vector<2x32xf32>
    tpu.vector_store %arg7[%c6, %c0_42], %173 {strides = array<i32>} : memref<16x32xf32, #tpu.memory_space<vmem>>, vector<2x32xf32>,
    %cst_43 = arith.constant dense<0.000000e+00> : vector<2x96xf32>
    %175 = tpu.matmul %173, %6, %cst_43 {dimension_numbers = #tpu.dot_dimension_numbers<[1], [0], [0], [1], [0, 0, 1, 1], [], []>} : vector<2x32xf32>, vector<32x96xf32>, vector<2x96xf32> -> vector<2x96xf32>
    %176 = vector.extract_strided_slice %49 {offsets = [8, 0], sizes = [2, 96], strides = [1, 1]} : vector<16x96xf32> to vector<2x96xf32>
    %177 = vector.extract_strided_slice %176 {offsets = [0, 0], sizes = [2, 32], strides = [1, 1]} : vector<2x96xf32> to vector<2x32xf32>
    %178 = vector.extract_strided_slice %175 {offsets = [0, 0], sizes = [2, 32], strides = [1, 1]} : vector<2x96xf32> to vector<2x32xf32>
    %179 = arith.addf %177, %178 : vector<2x32xf32>
    %180 = arith.negf %179 : vector<2x32xf32>
    %181 = math.exp %180 : vector<2x32xf32>
    %cst_44 = arith.constant 1.000000e+00 : f32
    %182 = vector.broadcast %cst_44 : f32 to vector<2x32xf32>
    %183 = arith.addf %182, %181 : vector<2x32xf32>
    %184 = arith.divf %182, %183 : vector<2x32xf32>
    %185 = vector.extract_strided_slice %176 {offsets = [0, 32], sizes = [2, 32], strides = [1, 1]} : vector<2x96xf32> to vector<2x32xf32>
    %186 = vector.extract_strided_slice %175 {offsets = [0, 32], sizes = [2, 32], strides = [1, 1]} : vector<2x96xf32> to vector<2x32xf32>
    %187 = arith.addf %185, %186 : vector<2x32xf32>
    %188 = arith.negf %187 : vector<2x32xf32>
    %189 = math.exp %188 : vector<2x32xf32>
    %cst_45 = arith.constant 1.000000e+00 : f32
    %190 = vector.broadcast %cst_45 : f32 to vector<2x32xf32>
    %191 = arith.addf %190, %189 : vector<2x32xf32>
    %192 = arith.divf %190, %191 : vector<2x32xf32>
    %193 = vector.extract_strided_slice %176 {offsets = [0, 64], sizes = [2, 32], strides = [1, 1]} : vector<2x96xf32> to vector<2x32xf32>
    %194 = vector.extract_strided_slice %175 {offsets = [0, 64], sizes = [2, 32], strides = [1, 1]} : vector<2x96xf32> to vector<2x32xf32>
    %195 = vector.broadcast %4 : vector<1x32xf32> to vector<2x32xf32>
    %196 = arith.addf %194, %195 : vector<2x32xf32>
    %197 = arith.mulf %184, %196 : vector<2x32xf32>
    %198 = arith.addf %193, %197 : vector<2x32xf32>
    %199 = math.tanh %198 : vector<2x32xf32>
    %cst_46 = arith.constant 1.000000e+00 : f32
    %200 = vector.broadcast %cst_46 : f32 to vector<2x32xf32>
    %201 = arith.subf %200, %192 : vector<2x32xf32>
    %202 = arith.mulf %201, %199 : vector<2x32xf32>
    %203 = arith.mulf %192, %173 : vector<2x32xf32>
    %204 = arith.addf %202, %203 : vector<2x32xf32>
    %c8 = arith.constant 8 : index
    %c0_47 = arith.constant 0 : index
    %205 = vector.load %arg7[%c8, %c0_47] : memref<16x32xf32, #tpu.memory_space<vmem>>, vector<2x32xf32>
    tpu.vector_store %arg7[%c8, %c0_47], %204 {strides = array<i32>} : memref<16x32xf32, #tpu.memory_space<vmem>>, vector<2x32xf32>,
    %cst_48 = arith.constant dense<0.000000e+00> : vector<2x96xf32>
    %206 = tpu.matmul %204, %6, %cst_48 {dimension_numbers = #tpu.dot_dimension_numbers<[1], [0], [0], [1], [0, 0, 1, 1], [], []>} : vector<2x32xf32>, vector<32x96xf32>, vector<2x96xf32> -> vector<2x96xf32>
    %207 = vector.extract_strided_slice %49 {offsets = [10, 0], sizes = [2, 96], strides = [1, 1]} : vector<16x96xf32> to vector<2x96xf32>
    %208 = vector.extract_strided_slice %207 {offsets = [0, 0], sizes = [2, 32], strides = [1, 1]} : vector<2x96xf32> to vector<2x32xf32>
    %209 = vector.extract_strided_slice %206 {offsets = [0, 0], sizes = [2, 32], strides = [1, 1]} : vector<2x96xf32> to vector<2x32xf32>
    %210 = arith.addf %208, %209 : vector<2x32xf32>
    %211 = arith.negf %210 : vector<2x32xf32>
    %212 = math.exp %211 : vector<2x32xf32>
    %cst_49 = arith.constant 1.000000e+00 : f32
    %213 = vector.broadcast %cst_49 : f32 to vector<2x32xf32>
    %214 = arith.addf %213, %212 : vector<2x32xf32>
    %215 = arith.divf %213, %214 : vector<2x32xf32>
    %216 = vector.extract_strided_slice %207 {offsets = [0, 32], sizes = [2, 32], strides = [1, 1]} : vector<2x96xf32> to vector<2x32xf32>
    %217 = vector.extract_strided_slice %206 {offsets = [0, 32], sizes = [2, 32], strides = [1, 1]} : vector<2x96xf32> to vector<2x32xf32>
    %218 = arith.addf %216, %217 : vector<2x32xf32>
    %219 = arith.negf %218 : vector<2x32xf32>
    %220 = math.exp %219 : vector<2x32xf32>
    %cst_50 = arith.constant 1.000000e+00 : f32
    %221 = vector.broadcast %cst_50 : f32 to vector<2x32xf32>
    %222 = arith.addf %221, %220 : vector<2x32xf32>
    %223 = arith.divf %221, %222 : vector<2x32xf32>
    %224 = vector.extract_strided_slice %207 {offsets = [0, 64], sizes = [2, 32], strides = [1, 1]} : vector<2x96xf32> to vector<2x32xf32>
    %225 = vector.extract_strided_slice %206 {offsets = [0, 64], sizes = [2, 32], strides = [1, 1]} : vector<2x96xf32> to vector<2x32xf32>
    %226 = vector.broadcast %4 : vector<1x32xf32> to vector<2x32xf32>
    %227 = arith.addf %225, %226 : vector<2x32xf32>
    %228 = arith.mulf %215, %227 : vector<2x32xf32>
    %229 = arith.addf %224, %228 : vector<2x32xf32>
    %230 = math.tanh %229 : vector<2x32xf32>
    %cst_51 = arith.constant 1.000000e+00 : f32
    %231 = vector.broadcast %cst_51 : f32 to vector<2x32xf32>
    %232 = arith.subf %231, %223 : vector<2x32xf32>
    %233 = arith.mulf %232, %230 : vector<2x32xf32>
    %234 = arith.mulf %223, %204 : vector<2x32xf32>
    %235 = arith.addf %233, %234 : vector<2x32xf32>
    %c10 = arith.constant 10 : index
    %c0_52 = arith.constant 0 : index
    %236 = vector.load %arg7[%c10, %c0_52] : memref<16x32xf32, #tpu.memory_space<vmem>>, vector<2x32xf32>
    tpu.vector_store %arg7[%c10, %c0_52], %235 {strides = array<i32>} : memref<16x32xf32, #tpu.memory_space<vmem>>, vector<2x32xf32>,
    %cst_53 = arith.constant dense<0.000000e+00> : vector<2x96xf32>
    %237 = tpu.matmul %235, %6, %cst_53 {dimension_numbers = #tpu.dot_dimension_numbers<[1], [0], [0], [1], [0, 0, 1, 1], [], []>} : vector<2x32xf32>, vector<32x96xf32>, vector<2x96xf32> -> vector<2x96xf32>
    %238 = vector.extract_strided_slice %49 {offsets = [12, 0], sizes = [2, 96], strides = [1, 1]} : vector<16x96xf32> to vector<2x96xf32>
    %239 = vector.extract_strided_slice %238 {offsets = [0, 0], sizes = [2, 32], strides = [1, 1]} : vector<2x96xf32> to vector<2x32xf32>
    %240 = vector.extract_strided_slice %237 {offsets = [0, 0], sizes = [2, 32], strides = [1, 1]} : vector<2x96xf32> to vector<2x32xf32>
    %241 = arith.addf %239, %240 : vector<2x32xf32>
    %242 = arith.negf %241 : vector<2x32xf32>
    %243 = math.exp %242 : vector<2x32xf32>
    %cst_54 = arith.constant 1.000000e+00 : f32
    %244 = vector.broadcast %cst_54 : f32 to vector<2x32xf32>
    %245 = arith.addf %244, %243 : vector<2x32xf32>
    %246 = arith.divf %244, %245 : vector<2x32xf32>
    %247 = vector.extract_strided_slice %238 {offsets = [0, 32], sizes = [2, 32], strides = [1, 1]} : vector<2x96xf32> to vector<2x32xf32>
    %248 = vector.extract_strided_slice %237 {offsets = [0, 32], sizes = [2, 32], strides = [1, 1]} : vector<2x96xf32> to vector<2x32xf32>
    %249 = arith.addf %247, %248 : vector<2x32xf32>
    %250 = arith.negf %249 : vector<2x32xf32>
    %251 = math.exp %250 : vector<2x32xf32>
    %cst_55 = arith.constant 1.000000e+00 : f32
    %252 = vector.broadcast %cst_55 : f32 to vector<2x32xf32>
    %253 = arith.addf %252, %251 : vector<2x32xf32>
    %254 = arith.divf %252, %253 : vector<2x32xf32>
    %255 = vector.extract_strided_slice %238 {offsets = [0, 64], sizes = [2, 32], strides = [1, 1]} : vector<2x96xf32> to vector<2x32xf32>
    %256 = vector.extract_strided_slice %237 {offsets = [0, 64], sizes = [2, 32], strides = [1, 1]} : vector<2x96xf32> to vector<2x32xf32>
    %257 = vector.broadcast %4 : vector<1x32xf32> to vector<2x32xf32>
    %258 = arith.addf %256, %257 : vector<2x32xf32>
    %259 = arith.mulf %246, %258 : vector<2x32xf32>
    %260 = arith.addf %255, %259 : vector<2x32xf32>
    %261 = math.tanh %260 : vector<2x32xf32>
    %cst_56 = arith.constant 1.000000e+00 : f32
    %262 = vector.broadcast %cst_56 : f32 to vector<2x32xf32>
    %263 = arith.subf %262, %254 : vector<2x32xf32>
    %264 = arith.mulf %263, %261 : vector<2x32xf32>
    %265 = arith.mulf %254, %235 : vector<2x32xf32>
    %266 = arith.addf %264, %265 : vector<2x32xf32>
    %c12 = arith.constant 12 : index
    %c0_57 = arith.constant 0 : index
    %267 = vector.load %arg7[%c12, %c0_57] : memref<16x32xf32, #tpu.memory_space<vmem>>, vector<2x32xf32>
    tpu.vector_store %arg7[%c12, %c0_57], %266 {strides = array<i32>} : memref<16x32xf32, #tpu.memory_space<vmem>>, vector<2x32xf32>,
    %cst_58 = arith.constant dense<0.000000e+00> : vector<2x96xf32>
    %268 = tpu.matmul %266, %6, %cst_58 {dimension_numbers = #tpu.dot_dimension_numbers<[1], [0], [0], [1], [0, 0, 1, 1], [], []>} : vector<2x32xf32>, vector<32x96xf32>, vector<2x96xf32> -> vector<2x96xf32>
    %269 = vector.extract_strided_slice %49 {offsets = [14, 0], sizes = [2, 96], strides = [1, 1]} : vector<16x96xf32> to vector<2x96xf32>
    %270 = vector.extract_strided_slice %269 {offsets = [0, 0], sizes = [2, 32], strides = [1, 1]} : vector<2x96xf32> to vector<2x32xf32>
    %271 = vector.extract_strided_slice %268 {offsets = [0, 0], sizes = [2, 32], strides = [1, 1]} : vector<2x96xf32> to vector<2x32xf32>
    %272 = arith.addf %270, %271 : vector<2x32xf32>
    %273 = arith.negf %272 : vector<2x32xf32>
    %274 = math.exp %273 : vector<2x32xf32>
    %cst_59 = arith.constant 1.000000e+00 : f32
    %275 = vector.broadcast %cst_59 : f32 to vector<2x32xf32>
    %276 = arith.addf %275, %274 : vector<2x32xf32>
    %277 = arith.divf %275, %276 : vector<2x32xf32>
    %278 = vector.extract_strided_slice %269 {offsets = [0, 32], sizes = [2, 32], strides = [1, 1]} : vector<2x96xf32> to vector<2x32xf32>
    %279 = vector.extract_strided_slice %268 {offsets = [0, 32], sizes = [2, 32], strides = [1, 1]} : vector<2x96xf32> to vector<2x32xf32>
    %280 = arith.addf %278, %279 : vector<2x32xf32>
    %281 = arith.negf %280 : vector<2x32xf32>
    %282 = math.exp %281 : vector<2x32xf32>
    %cst_60 = arith.constant 1.000000e+00 : f32
    %283 = vector.broadcast %cst_60 : f32 to vector<2x32xf32>
    %284 = arith.addf %283, %282 : vector<2x32xf32>
    %285 = arith.divf %283, %284 : vector<2x32xf32>
    %286 = vector.extract_strided_slice %269 {offsets = [0, 64], sizes = [2, 32], strides = [1, 1]} : vector<2x96xf32> to vector<2x32xf32>
    %287 = vector.extract_strided_slice %268 {offsets = [0, 64], sizes = [2, 32], strides = [1, 1]} : vector<2x96xf32> to vector<2x32xf32>
    %288 = vector.broadcast %4 : vector<1x32xf32> to vector<2x32xf32>
    %289 = arith.addf %287, %288 : vector<2x32xf32>
    %290 = arith.mulf %277, %289 : vector<2x32xf32>
    %291 = arith.addf %286, %290 : vector<2x32xf32>
    %292 = math.tanh %291 : vector<2x32xf32>
    %cst_61 = arith.constant 1.000000e+00 : f32
    %293 = vector.broadcast %cst_61 : f32 to vector<2x32xf32>
    %294 = arith.subf %293, %285 : vector<2x32xf32>
    %295 = arith.mulf %294, %292 : vector<2x32xf32>
    %296 = arith.mulf %285, %266 : vector<2x32xf32>
    %297 = arith.addf %295, %296 : vector<2x32xf32>
    %c14 = arith.constant 14 : index
    %c0_62 = arith.constant 0 : index
    %298 = vector.load %arg7[%c14, %c0_62] : memref<16x32xf32, #tpu.memory_space<vmem>>, vector<2x32xf32>
    tpu.vector_store %arg7[%c14, %c0_62], %297 {strides = array<i32>} : memref<16x32xf32, #tpu.memory_space<vmem>>, vector<2x32xf32>,
    %c0_63 = arith.constant 0 : index
    %c0_64 = arith.constant 0 : index
    %299 = vector.load %arg6[%c0_63, %c0_64] : memref<2x32xf32, #tpu.memory_space<vmem>>, vector<2x32xf32>
    tpu.vector_store %arg6[%c0_63, %c0_64], %297 {strides = array<i32>} : memref<2x32xf32, #tpu.memory_space<vmem>>, vector<2x32xf32>,
    %c0_65 = arith.constant 0 : index
    %c0_66 = arith.constant 0 : index
    %300 = vector.load %arg7[%c0_65, %c0_66] : memref<16x32xf32, #tpu.memory_space<vmem>>, vector<16x32xf32>
    %cst_67 = arith.constant dense<0.000000e+00> : vector<16x128xf32>
    %301 = tpu.matmul %300, %8, %cst_67 {dimension_numbers = #tpu.dot_dimension_numbers<[1], [0], [0], [1], [0, 0, 1, 1], [], []>} : vector<16x32xf32>, vector<32x128xf32>, vector<16x128xf32> -> vector<16x128xf32>
    %302 = vector.broadcast %9 : vector<1x128xf32> to vector<16x128xf32>
    %303 = arith.addf %301, %302 : vector<16x128xf32>
    %cst_68 = arith.constant dense<0xFF800000> : vector<16xf32>
    %304 = vector.multi_reduction <maximumf>, %303, %cst_68 [1] : vector<16x128xf32> to vector<16xf32>
    %305 = vector.shape_cast %304 : vector<16xf32> to vector<16x1xf32>
    %306 = vector.broadcast %305 : vector<16x1xf32> to vector<16x128xf32>
    %307 = arith.subf %303, %306 : vector<16x128xf32>
    %308 = math.exp %307 : vector<16x128xf32>
    %cst_69 = arith.constant dense<0.000000e+00> : vector<16xf32>
    %309 = vector.multi_reduction <add>, %308, %cst_69 [1] : vector<16x128xf32> to vector<16xf32>
    %310 = vector.shape_cast %309 : vector<16xf32> to vector<16x1xf32>
    %311 = math.log %310 : vector<16x1xf32>
    %312 = arith.addf %305, %311 : vector<16x1xf32>
    %313 = vector.broadcast %312 : vector<16x1xf32> to vector<16x128xf32>
    %314 = arith.subf %303, %313 : vector<16x128xf32>
    %c0_70 = arith.constant 0 : index
    %c0_71 = arith.constant 0 : index
    %315 = vector.load %arg5[%c0_70, %c0_71] : memref<16x128xf32, #tpu.memory_space<vmem>>, vector<16x128xf32>
    tpu.vector_store %arg5[%c0_70, %c0_71], %314 {strides = array<i32>} : memref<16x128xf32, #tpu.memory_space<vmem>>, vector<16x128xf32>,
    return
  }
}

</mosaic_0001>

<bundles_post_ra>
// kernel: generator_forward.1
= control target key start
LH: loop header
LB: loop body
LE: loop exit
PB: predicated region body
PF: predicated region fallthrough
CT: control target
= control target key end

     0   :  { %12 = vsyncpa [#allocation4], 0  ;;  %s1460_s0 = inlined_call_operand.vmem [shape: s32[16,1], index: 0, kind: input, shape index: {}]   ;;  %s1461_s1 = inlined_call_operand.hbm [shape: f32[176,32], index: 1, kind: input, shape index: {}]   ;;  %s1462_s2 = inlined_call_operand.hbm [shape: f32[72,96], index: 2, kind: input, shape index: {}]   ;;  %s1463_s3 = inlined_call_operand.hbm [shape: f32[40,128], index: 3, kind: input, shape index: {}]   ;;  %s1464_s4 = inlined_call_operand.vmem [shape: f32[2,32], index: 4, kind: input, shape index: {}]   ;;  %s1465_s5 = inlined_call_operand.hbm [shape: f32[16,128], index: 5, kind: output, shape index: {0}]   ;;  %s1466_s6 = inlined_call_operand.hbm [shape: f32[2,32], index: 6, kind: output, shape index: {1}]  }
   0x1   :  { %13 = vsyncpa [#allocation7], 0 }
   0x2   :  { %14 = vsyncpa [#allocation5], 0 }
   0x3   :  { %15 = vsyncpa [#allocation11], 0  ;;  %s35_s23 = sshll.u32 %s1462_s2, 4  ;;  %s1220_s24 = smov [#allocation6]   ;;  %s36_s23 = int_to_ptr.hbm [resolvable:$true] %s35_s23 }
   0x4   :  { %s37_s25 = sshll.u32 %s1220_s24, 4  ;;  %s22_s28 = sshll.u32 %s1461_s1, 4  ;;  %s38_s25 = int_to_ptr.vmem [resolvable:$true] %s37_s25  ;;  %s23_s28 = int_to_ptr.hbm [resolvable:$true] %s22_s28 }
   0x5   :  { %s1221_s29 = smov 128   ;;  %s1222_s30 = smov 8  }
   0x6   :  { %43 = dma.hbm_to_vmem [thread:$0]  %s36_s23, 1152, %s38_s25, [#allocation7], %s1221_s29, %s1221_s29, %s1222_s30  }
   0x7   :  { %s1223_s7 = smov [#allocation3]   ;;  %s48_s2 = sshll.u32 %s1463_s3, 4  ;;  %s49_s2 = int_to_ptr.hbm [resolvable:$true] %s48_s2 }
   0x8   :  { %s24_s8 = sshll.u32 %s1223_s7, 4  ;;  %s1224_s1 = smov [#allocation8]   ;;  %s25_s8 = int_to_ptr.vmem [resolvable:$true] %s24_s8 }
   0x9   :  { %30 = dma.hbm_to_vmem [thread:$0]  %s23_s28, 2816, %s25_s8, [#allocation4], %s1221_s29, %s1221_s29, %s1222_s30  }
   0xa   :  { %s50_s11 = sshll.u32 %s1224_s1, 4  ;;  %s51_s11 = int_to_ptr.vmem [resolvable:$true] %s50_s11 }
   0xb   :  { %56 = dma.hbm_to_vmem [thread:$0]  %s49_s2, 640, %s51_s11, [#allocation7], %s1221_s29, %s1221_s29, %s1222_s30  }
   0xc   :  { %1212 = dma.done.wait [#allocation4], 2816  }
   0xd   :  { %1213 = vsyncadd [#allocation4], 4294964480 }
   0xe   :  { %1214 = dma.done.wait [#allocation7], 1792  }
   0xf   :  { %1215 = vsyncadd [#allocation7], 4294965504  ;;  %v1225_v0 = vmov 0   ;;  %v109_v1 = vld [vmem:[%s1460_s0] sm:$0xff]  ;;  %vm111_vm0 = vcmask 1041408   ;;  %v110_v2 = vld [vmem:[%s1460_s0 + $0x8] sm:$0xff]  ;;  %v125_v25 = vlaneseq }
  0x10   :  { %1028 = vset.pattern.permute.xlu0 %v1225_v0  ;;  %1029 = vset.pattern.permute.xlu1 %v1225_v0  ;;  %v79_v3 = vld [vmem:[#allocation3 + $0x40] sm:$0x3]  ;;  %v112_v4 = vrot.slane %v109_v1, 6  ;;  %v118_v5 = vadd.s32 44, %v109_v1  ;;  %v119_v6 = vadd.s32 44, %v110_v2  ;;  %v78_v7 = vld [vmem:[#allocation3 + $0x38] sm:$0xff] }
  0x11   :  { %1030 = vset.pattern.permute.xlu2 %v1225_v0  ;;  %987 = vmatpush.msk.msra.mxu0 %vm111_vm0, %v79_v3  ;;  %vm120_vm1 = vcmask 1045504   ;;  %v117_v8 = vadd.s32 22, %v110_v2  ;;  %v113_v13 = vrot.slane %v110_v2, 6  ;;  %v116_v14 = vadd.s32 22, %v109_v1  ;;  %v77_v17 = vld [vmem:[#allocation3 + $0x30] sm:$0xff]  ;;  %v76_v18 = vld [vmem:[#allocation3 + $0x28] sm:$0xff] }
  0x12   :  { %v115_v9 = vsel %vm111_vm0, 4294967295, %v112_v4  ;;  %v121_v10 = vrot.slane %v118_v5, 2  ;;  %v122_v11 = vrot.slane %v119_v6, 2  ;;  %v75_v19 = vld [vmem:[#allocation3 + $0x20] sm:$0xff]  ;;  %v74_v20 = vld [vmem:[#allocation3 + $0x18] sm:$0xff]  ;;  %v73_v21 = vld [vmem:[#allocation3 + $0x10] sm:$0xff] }
  0x13   :  { %178 = vmatpush.msra.mxu0 %v78_v7  ;;  %128 = vperm.xlu0 %1028, %v115_v9   ;;  %v114_v16 = vsel %vm111_vm0, %v112_v4, %v113_v13  ;;  %v72_v22 = vld [vmem:[#allocation3 + $0x8] sm:$0xff]  ;;  %v71_v23 = vld [vmem:[#allocation3] sm:$0xff]  ;;  %v126_v28 = vand.u32 127, %v125_v25  ;;  %vm160_vm6 = vcmask 539648   ;;  %v1226_v31 = vmov 0.0   ;;  %s1227_s0 = smov 32  }
  0x14   :  { %139 = vperm.xlu2 %1030, %v117_v8   ;;  %v123_v12 = vsel %vm120_vm1, %v121_v10, %v122_v11  ;;  %v124_v15 = vsel %vm120_vm1, %v122_v11, 4294967295  ;;  %v1031_v35 = vld [vmem:[#allocation3 + $0xa8] ss:$0 sm:$0xff]  ;;  %s1228_s15 = smov 64   ;;  %v91_v49 = vld [vmem:[#allocation3 + $0xa0] sm:$0xff]  ;;  %v90_v50 = vld [vmem:[#allocation3 + $0x98] sm:$0xff] }
  0x15   :  { %146 = vperm.xlu1 %1029, %v123_v12   ;;  %179 = vmatpush.msra.mxu0 %v77_v17  ;;  %v89_v51 = vld [vmem:[#allocation3 + $0x90] sm:$0xff]  ;;  %v88_v52 = vld [vmem:[#allocation3 + $0x88] sm:$0xff]  ;;  %v87_v53 = vld [vmem:[#allocation3 + $0x80] sm:$0xff]  ;;  %vm224_vm13 = vcmask 523264   ;;  %vm221_vm14 = vcmask 261120   ;;  %vm228_vm15 = vcmask 785408  }
  0x16   :  { %239 = vmatpush.msra.mxu1 %v91_v49  ;;  %v86_v54 = vld [vmem:[#allocation3 + $0x78] sm:$0xff]  ;;  %v85_v55 = vld [vmem:[#allocation3 + $0x70] sm:$0xff]  ;;  %v84_v56 = vld [vmem:[#allocation3 + $0x68] sm:$0xff]  ;;  %s1230_s18 = smov [#allocation10]   ;;  %s969_s22 = sshll.u32 %s1466_s6, 4  ;;  %s970_s22 = int_to_ptr.hbm [resolvable:$true] %s969_s22 }
  0x17   :  { %180 = vmatpush.msra.mxu0 %v76_v18  ;;  %v83_v57 = vld [vmem:[#allocation3 + $0x60] sm:$0xff]  ;;  %v82_v58 = vld [vmem:[#allocation3 + $0x58] sm:$0xff]  ;;  %v81_v59 = vld [vmem:[#allocation3 + $0x50] sm:$0xff]  ;;  %s967_s19 = sshll.u32 %s1230_s18, 4  ;;  %s1231_s23 = smov [#allocation9]   ;;  %s968_s19 = int_to_ptr.vmem [resolvable:$true] %s967_s19 }
  0x18   :  { %240 = vmatpush.msra.mxu1 %v90_v50  ;;  %v80_v60 = vld [vmem:[#allocation3 + $0x48] sm:$0xff]  ;;  %v97_v7 = vld [vmem:[#allocation6 + $0x10] sm:$0xff]  ;;  %v96_v8 = vld [vmem:[#allocation6 + $0x8] sm:$0xff]  ;;  %s953_s24 = sshll.u32 %s1231_s23, 4  ;;  %s955_s6 = sshll.u32 %s1465_s5, 4  ;;  %s954_s24 = int_to_ptr.vmem [resolvable:$true] %s953_s24  ;;  %s956_s6 = int_to_ptr.hbm [resolvable:$true] %s955_s6 }
  0x19   :  { %181 = vmatpush.msra.mxu0 %v75_v19  ;;  %v98_v61 = vld [vmem:[#allocation6 + $0x18] sm:$0xff]  ;;  %v95_v9 = vld [vmem:[#allocation6] sm:$0xff]  ;;  %v1308_v11 = vld [vmem:[#allocation6 + $0x30] sm:$0xff] }
  0x1a   :  { %241 = vmatpush.msra.mxu1 %v89_v51  ;;  %279 = vmatpush.msra.mxu2 %v98_v61  ;;  %v1306_v10 = vld [vmem:[#allocation6 + $0x38] sm:$0xff]  ;;  %v1312_v12 = vld [vmem:[#allocation6 + $0x28] sm:$0xff]  ;;  %v1318_v13 = vld [vmem:[#allocation6 + $0x20] sm:$0xff] }
  0x1b   :  { %136 = vperm.xlu0 %1028, %v116_v14   ;;  %182 = vmatpush.msra.mxu0 %v74_v20  ;;  %v1033_v14 = vld [vmem:[#allocation3 + $0xaa] ss:$0 sm:$0xff] }
  0x1c   :  { %149 = vperm.xlu2 %1030, %v124_v15   ;;  %242 = vmatpush.msra.mxu1 %v88_v52  ;;  %v1032_v15 = vld [vmem:[#allocation3 + $0xa9] ss:$0 sm:$0xff] }
  0x1d   :  { %131 = vperm.xlu1 %1029, %v114_v16   ;;  %183 = vmatpush.msra.mxu0 %v73_v21 }
  0x1e   :  { %243 = vmatpush.msra.mxu1 %v87_v53  ;;  %1012 = vmatpush.msra.mxu3 %v98_v61 }
  0x1f   :  { %184 = vmatpush.msra.mxu0 %v72_v22  ;;  %280 = vmatpush.msra.mxu2 %v97_v7  ;;  %v290_v22 = vld [vmem:[%s1464_s4] sm:$0x3]  ;;  %s1229_s4 = smov 96  }
  0x20   :  { %244 = vmatpush.msra.mxu1 %v86_v54  ;;  %1013 = vmatpush.msra.mxu3 %v97_v7 }
  0x21   :  { %185 = vmatpush.msra.mxu0 %v71_v23  ;;  %281 = vmatpush.msra.mxu2 %v96_v8  ;;  %v1034_v23 = vld [vmem:[#allocation6 + $0x40] ss:$0 sm:$0xff] }
  0x22   :  { %245 = vmatpush.msra.mxu1 %v85_v55  ;;  %1014 = vmatpush.msra.mxu3 %v96_v8 }
  0x23   :  { %282 = vmatpush.msra.mxu2 %v95_v9  ;;  %757 = vmatpush.msrb.mxu0 %v1306_v10 }
  0x24   :  { %246 = vmatpush.msra.mxu1 %v84_v56  ;;  %1015 = vmatpush.msra.mxu3 %v95_v9 }
  0x25   :  { %459 = vmatpush.msrb.mxu2 %v1306_v10  ;;  %758 = vmatpush.msrb.mxu0 %v1308_v11 }
  0x26   :  { %247 = vmatpush.msra.mxu1 %v83_v57  ;;  %306 = vmatpush.msrb.mxu3 %v1306_v10 }
  0x27   :  { %460 = vmatpush.msrb.mxu2 %v1308_v11  ;;  %759 = vmatpush.msrb.mxu0 %v1312_v12 }
  0x28   :  { %248 = vmatpush.msra.mxu1 %v82_v58  ;;  %307 = vmatpush.msrb.mxu3 %v1308_v11 }
  0x29   :  { %461 = vmatpush.msrb.mxu2 %v1312_v12  ;;  %760 = vmatpush.msrb.mxu0 %v1318_v13 }
  0x2a   :  { %249 = vmatpush.msra.mxu1 %v81_v59  ;;  %308 = vmatpush.msrb.mxu3 %v1312_v12 }
  0x2b   :  { %462 = vmatpush.msrb.mxu2 %v1318_v13 }
  0x2c   :  { %250 = vmatpush.msra.mxu1 %v80_v60  ;;  %309 = vmatpush.msrb.mxu3 %v1318_v13 }
  0x2e   :  { %833 = vmatpush.msrb.mxu1 %v1306_v10 }
  0x30   :  { %834 = vmatpush.msrb.mxu1 %v1308_v11 }
  0x32   :  { %835 = vmatpush.msrb.mxu1 %v1312_v12 }
  0x34   :  { %836 = vmatpush.msrb.mxu1 %v1318_v13 }
  0x6e   :  { %v140_v27 = vpop.permute.xlu2 %139 }
  0x6f   :  { %vm142_vm7 = vcmp.eq.s32.totalorder %v126_v28, %v140_v27 }
  0x76   :  { %v150_v33 = vpop.permute.xlu2 %149 }
  0x77   :  { %vm152_vm11 = vcmp.eq.s32.totalorder %v126_v28, %v150_v33 }
  0x85   :  { %v129_v24 = vpop.permute.xlu0 %128 }
  0x86   :  { %vm133_vm3 = vcmp.eq.s32.totalorder %v126_v28, %v129_v24 }
  0x87   :  { %v147_v26 = vpop.permute.xlu1 %146 }
  0x88   :  { %vm151_vm2 = vcmp.eq.s32.totalorder %v126_v28, %v147_v26 }
  0x8d   :  { %v137_v29 = vpop.permute.xlu0 %136 }
  0x8e   :  { %vm141_vm4 = vcmp.eq.s32.totalorder %v126_v28, %v137_v29 }
  0x8f   :  { %vm143_vm5 = vmor %vm133_vm3, %vm141_vm4  ;;  %v132_v30 = vpop.permute.xlu1 %131  ;;  %vm366_vm4 = vcmask 254976  }
  0x90   :  { %vm153_vm8 = vmor %vm143_vm5, %vm151_vm2  ;;  %vm134_vm9 = vcmp.eq.s32.totalorder %v126_v28, %v132_v30 }
  0x91   :  { %v985_v32 = vsel %vm153_vm8, 1.0, %v1226_v31  ;;  %vm144_vm10 = vmor %vm134_vm9, %vm142_vm7 }
  0x92   :  { %988 = vmatmul.msk.f32.vlgmr.msra.gmra.mxu0 %vm160_vm6, %v985_v32  ;;  %vm154_vm12 = vmor %vm144_vm10, %vm152_vm11 }
  0x93   :  { %v986_v34 = vsel %vm154_vm12, 1.0, %v1226_v31 }
  0x9a   :  { %989 = vmatmul.msk.f32.gmra.mxu0 %vm160_vm6, %v986_v34 }
 0x10f   :  { %v187_v36 = vpop.f32.mrf.mxu0 }
 0x110   :  { %v188_v37 = vadd.f32 %v1031_v35, %v187_v36 }
 0x112   :  { %v193_v38 = vmax.f32 %v188_v37, 0.0 }
 0x114   :  { %208 = vrot.lane.b32.xlu0 %v193_v38, %s1227_s0  ;;  %v197_v42 = vrot.slane %v193_v38, 6  ;;  %v203_v43 = vrot.slane %v193_v38, 2 }
 0x116   :  { %v202_v63 = vsel %vm111_vm0, 0.0, %v197_v42 }
 0x117   :  { %v190_v39 = vpop.f32.mrf.mxu0 }
 0x118   :  { %v191_v40 = vadd.f32 %v1031_v35, %v190_v39 }
 0x11a   :  { %v194_v41 = vmax.f32 %v191_v40, 0.0 }
 0x11c   :  { %v198_v44 = vrot.slane %v194_v41, 6  ;;  %210 = vrot.lane.b32.xlu2 %v194_v41, %s1227_s0  ;;  %v204_v45 = vrot.slane %v194_v41, 2 }
 0x11e   :  { %v207_v46 = vsel %vm120_vm1, %v204_v45, 0.0  ;;  %v205_v47 = vsel %vm120_vm1, %v203_v43, %v204_v45  ;;  %v199_v48 = vsel %vm111_vm0, %v197_v42, %v198_v44 }
 0x11f   :  { %217 = vrot.lane.b32.xlu0 %v207_v46, %s1228_s15  ;;  %215 = vrot.lane.b32.xlu1 %v205_v47, %s1228_s15 }
 0x127   :  { %336 = vrot.lane.b32.xlu1 %v1033_v14, %s1228_s15 }
 0x176   :  { %v211_v3 = vpop.permute.xlu2 %210 }
 0x177   :  { %v223_v5 = vsel %vm221_vm14, %v199_v48, %v211_v3 }
 0x186   :  { %v209_v62 = vpop.permute.xlu0 %208 }
 0x187   :  { %v222_v0 = vsel %vm221_vm14, %v202_v63, %v209_v62 }
 0x191   :  { %v216_v1 = vpop.permute.xlu1 %215  ;;  %v218_v4 = vpop.permute.xlu0 %217 }
 0x192   :  { %v225_v2 = vsel %vm224_vm13, %v222_v0, %v216_v1  ;;  %v226_v6 = vsel %vm224_vm13, %v223_v5, %v218_v4 }
 0x193   :  { %990 = vmatmul.msk.f32.vlgmr.msra.gmra.mxu1 %vm228_vm15, %v225_v2 }
 0x199   :  { %v1351_v26 = vpop.permute.xlu1 %336 }
 0x19b   :  { %991 = vmatmul.msk.f32.gmra.mxu1 %vm228_vm15, %v226_v6 }
 0x210   :  { %v252_v16 = vpop.f32.mrf.mxu1 }
 0x211   :  { %v253_v17 = vadd.f32 %v1032_v15, %v252_v16 }
 0x213   :  { %v258_v18 = vmax.f32 %v253_v17, 0.0 }
 0x215   :  { %992 = vmatmul.msk.f32.vlgmr.msra.gmra.mxu2 %vm221_vm14, %v258_v18 }
 0x216   :  { %613 = vmatpush.msra.mxu2 %v1306_v10 }
 0x218   :  { %v255_v19 = vpop.f32.mrf.mxu1  ;;  %614 = vmatpush.msra.mxu2 %v1308_v11 }
 0x219   :  { %v256_v20 = vadd.f32 %v1032_v15, %v255_v19 }
 0x21a   :  { %615 = vmatpush.msra.mxu2 %v1312_v12 }
 0x21b   :  { %v259_v21 = vmax.f32 %v256_v20, 0.0 }
 0x21c   :  { %616 = vmatpush.msra.mxu2 %v1318_v13 }
 0x21d   :  { %993 = vmatmul.msk.f32.vlgmr.msra.gmra.mxu3 %vm221_vm14, %v259_v21 }
 0x21e   :  { %382 = vmatpush.msra.mxu3 %v1306_v10 }
 0x220   :  { %383 = vmatpush.msra.mxu3 %v1308_v11 }
 0x222   :  { %384 = vmatpush.msra.mxu3 %v1312_v12 }
 0x224   :  { %385 = vmatpush.msra.mxu3 %v1318_v13 }
 0x225   :  { %994 = vmatmul.msk.f32.vlgmr.msrb.gmra.mxu3 %vm221_vm14, %v290_v22 }
 0x226   :  { %536 = vmatpush.msrb.mxu3 %v1306_v10 }
 0x228   :  { %537 = vmatpush.msrb.mxu3 %v1308_v11 }
 0x22a   :  { %538 = vmatpush.msrb.mxu3 %v1312_v12 }
 0x22c   :  { %539 = vmatpush.msrb.mxu3 %v1318_v13 }
 0x298   :  { %v284_v29 = vpop.f32.mrf.mxu2 }
 0x299   :  { %v1356_v30 = vadd.f32 %v1034_v23, %v284_v29 }
 0x2a0   :  { %v287_v24 = vpop.f32.mrf.mxu3 }
 0x2a1   :  { %v1349_v25 = vadd.f32 %v1034_v23, %v287_v24 }
 0x2a8   :  { %v311_v27 = vpop.f32.mrf.mxu3 }
 0x2a9   :  { %v339_v28 = vadd.f32 %v1351_v26, %v311_v27  ;;  %v314_v31 = vadd.f32 %v311_v27, %v1356_v30 }
 0x2ab   :  { %341 = vrot.lane.b32.xlu2 %v339_v28, %s1228_s15  ;;  %v995_v32 = vmul.f32 -1.442695, %v314_v31 }
 0x2ad   :  { %1036 = vpow2.f32 %v995_v32 }
 0x2b3   :  { %357 = vrot.lane.b32.xlu2 %v290_v22, %s1227_s0  ;;  %v1037_v33 = vpop.eup %1036 }
 0x2b4   :  { %v318_v34 = vadd.f32 1.0, %v1037_v33 }
 0x2b6   :  { %1038 = vrcp.f32 %v318_v34  ;;  %v330_v40 = vand.u32 2147483648, %v318_v34  ;;  %vm324_vm1 = vweird.f32 %v318_v34  ;;  %v328_v41 = vand.u32 2147483647, %v318_v34 }
 0x2b8   :  { %v331_v43 = vor.u32 1.1754944e-38, %v330_v40  ;;  %vm329_vm3 = vcmp.eq.f32.partialorder %v328_v41, 8.507059e+37 }
 0x2bc   :  { %v1039_v35 = vpop.eup %1038 }
 0x2bd   :  { %v320_v36 = vmul.f32 %v1039_v35, %v318_v34  ;;  %vm325_vm0 = vweird.f32 %v1039_v35 }
 0x2be   :  { %vm326_vm2 = vmor %vm324_vm1, %vm325_vm0 }
 0x2bf   :  { %v321_v37 = vsub.f32 1.0, %v320_v36 }
 0x2c1   :  { %v322_v38 = vmul.f32 %v1039_v35, %v321_v37 }
 0x2c3   :  { %v323_v39 = vadd.f32 %v1039_v35, %v322_v38 }
 0x2c5   :  { %v327_v42 = vsel %vm326_vm2, %v1039_v35, %v323_v39 }
 0x2c6   :  { %v332_v45 = vsel %vm329_vm3, %v331_v43, %v327_v42 }
 0x2c7   :  { %v351_v51 = vsub.f32 1.0, %v332_v45 }
 0x305   :  { %v342_v44 = vpop.permute.xlu2 %341 }
 0x306   :  { %v344_v46 = vmul.f32 %v342_v44, %v332_v45 }
 0x308   :  { %346 = vrot.lane.b32.xlu0 %v344_v46, %s1228_s15 }
 0x30d   :  { %v358_v50 = vpop.permute.xlu2 %357 }
 0x30e   :  { %v360_v53 = vmul.f32 %v358_v50, %v332_v45 }
 0x37a   :  { %v347_v47 = vpop.permute.xlu0 %346 }
 0x37b   :  { %v349_v48 = vadd.f32 %v347_v47, %v1356_v30 }
 0x37d   :  { %1040 = vtanh.f32 %v349_v48 }
 0x383   :  { %v1041_v49 = vpop.eup %1040 }
 0x384   :  { %353 = vrot.lane.b32.xlu1 %v1041_v49, %s1229_s4 }
 0x3f6   :  { %v354_v52 = vpop.permute.xlu1 %353 }
 0x3f7   :  { %v356_v54 = vmul.f32 %v354_v52, %v351_v51 }
 0x3f9   :  { %v361_v55 = vadd.f32 %v360_v53, %v356_v54 }
 0x3fb   :  { %363 = vrot.lane.b32.xlu0 %v361_v55, %s1229_s4  ;;  %v432_v16 = vrot.slane %v361_v55, 6 }
 0x46d   :  { %v364_v56 = vpop.permute.xlu0 %363 }
 0x46e   :  { %367 = vst.msk [vmem:[#allocation2] sm:$0x3] %vm366_vm4, %v364_v56  ;;  %996 = vmatmul.msk.f32.vlgmr.msra.gmra.mxu3 %vm221_vm14, %v364_v56 }
 0x46f   :  { %681 = vmatpush.msra.mxu3 %v1306_v10 }
 0x471   :  { %682 = vmatpush.msra.mxu3 %v1308_v11 }
 0x473   :  { %683 = vmatpush.msra.mxu3 %v1312_v12 }
 0x475   :  { %684 = vmatpush.msra.mxu3 %v1318_v13 }
 0x4f1   :  { %v387_v57 = vpop.f32.mrf.mxu3 }
 0x4f2   :  { %v413_v58 = vadd.f32 %v387_v57, %v1351_v26  ;;  %v391_v60 = vrot.slane %v387_v57, 6 }
 0x4f4   :  { %v415_v59 = vrot.slane %v413_v58, 6  ;;  %v393_v61 = vadd.f32 %v391_v60, %v1356_v30 }
 0x4f6   :  { %416 = vrot.lane.b32.xlu1 %v415_v59, %s1228_s15  ;;  %v997_v62 = vmul.f32 -1.442695, %v393_v61 }
 0x4f8   :  { %1042 = vpow2.f32 %v997_v62 }
 0x4fe   :  { %v1043_v63 = vpop.eup %1042 }
 0x4ff   :  { %v397_v0 = vadd.f32 1.0, %v1043_v63 }
 0x501   :  { %1044 = vrcp.f32 %v397_v0  ;;  %v409_v6 = vand.u32 2147483648, %v397_v0  ;;  %vm403_vm6 = vweird.f32 %v397_v0  ;;  %v407_v7 = vand.u32 2147483647, %v397_v0 }
 0x503   :  { %v410_v9 = vor.u32 1.1754944e-38, %v409_v6  ;;  %vm408_vm8 = vcmp.eq.f32.partialorder %v407_v7, 8.507059e+37 }
 0x507   :  { %v1045_v1 = vpop.eup %1044 }
 0x508   :  { %v399_v2 = vmul.f32 %v1045_v1, %v397_v0  ;;  %vm404_vm5 = vweird.f32 %v1045_v1 }
 0x509   :  { %vm405_vm7 = vmor %vm403_vm6, %vm404_vm5 }
 0x50a   :  { %v400_v3 = vsub.f32 1.0, %v399_v2 }
 0x50c   :  { %v401_v4 = vmul.f32 %v1045_v1, %v400_v3 }
 0x50e   :  { %v402_v5 = vadd.f32 %v1045_v1, %v401_v4 }
 0x510   :  { %v406_v8 = vsel %vm405_vm7, %v1045_v1, %v402_v5 }
 0x511   :  { %v411_v11 = vsel %vm408_vm8, %v410_v9, %v406_v8 }
 0x512   :  { %v426_v17 = vsub.f32 1.0, %v411_v11  ;;  %v434_v20 = vmul.f32 %v432_v16, %v411_v11 }
 0x568   :  { %v417_v10 = vpop.permute.xlu1 %416 }
 0x569   :  { %v419_v12 = vmul.f32 %v417_v10, %v411_v11 }
 0x56b   :  { %421 = vrot.lane.b32.xlu2 %v419_v12, %s1228_s15 }
 0x5c5   :  { %v422_v13 = vpop.permute.xlu2 %421 }
 0x5c6   :  { %v424_v14 = vadd.f32 %v422_v13, %v1356_v30 }
 0x5c8   :  { %1046 = vtanh.f32 %v424_v14 }
 0x5ce   :  { %v1047_v15 = vpop.eup %1046 }
 0x5cf   :  { %428 = vrot.lane.b32.xlu0 %v1047_v15, %s1229_s4 }
 0x641   :  { %v429_v18 = vpop.permute.xlu0 %428 }
 0x642   :  { %v431_v19 = vmul.f32 %v429_v18, %v426_v17 }
 0x644   :  { %v1375_v21 = vadd.f32 %v434_v20, %v431_v19 }
 0x646   :  { %v442_v22 = vrot.slane %v1375_v21, 2  ;;  %v509_v51 = vrot.slane %v1375_v21, 6 }
 0x648   :  { %443 = vrot.lane.b32.xlu1 %v442_v22, %s1229_s4 }
 0x6ba   :  { %v444_v23 = vpop.permute.xlu1 %443 }
 0x6bb   :  { %998 = vmatmul.msk.f32.vlgmr.msrb.gmra.mxu2 %vm221_vm14, %v444_v23 }
 0x73e   :  { %v464_v24 = vpop.f32.mrf.mxu2 }
 0x73f   :  { %v490_v27 = vadd.f32 %v464_v24, %v1351_v26  ;;  %v468_v29 = vrot.slane %v464_v24, 4 }
 0x741   :  { %v492_v28 = vrot.slane %v490_v27, 4  ;;  %v470_v31 = vadd.f32 %v468_v29, %v1356_v30 }
 0x743   :  { %493 = vrot.lane.b32.xlu2 %v492_v28, %s1228_s15  ;;  %v999_v32 = vmul.f32 -1.442695, %v470_v31 }
 0x745   :  { %1048 = vpow2.f32 %v999_v32 }
 0x74b   :  { %v1049_v33 = vpop.eup %1048 }
 0x74c   :  { %v474_v34 = vadd.f32 1.0, %v1049_v33 }
 0x74e   :  { %1050 = vrcp.f32 %v474_v34  ;;  %v486_v40 = vand.u32 2147483648, %v474_v34  ;;  %vm480_vm10 = vweird.f32 %v474_v34  ;;  %v484_v41 = vand.u32 2147483647, %v474_v34 }
 0x750   :  { %v487_v43 = vor.u32 1.1754944e-38, %v486_v40  ;;  %vm485_vm12 = vcmp.eq.f32.partialorder %v484_v41, 8.507059e+37 }
 0x754   :  { %v1051_v35 = vpop.eup %1050 }
 0x755   :  { %v476_v36 = vmul.f32 %v1051_v35, %v474_v34  ;;  %vm481_vm9 = vweird.f32 %v1051_v35 }
 0x756   :  { %vm482_vm11 = vmor %vm480_vm10, %vm481_vm9 }
 0x757   :  { %v477_v37 = vsub.f32 1.0, %v476_v36 }
 0x759   :  { %v478_v38 = vmul.f32 %v1051_v35, %v477_v37 }
 0x75b   :  { %v479_v39 = vadd.f32 %v1051_v35, %v478_v38 }
 0x75d   :  { %v483_v42 = vsel %vm482_vm11, %v1051_v35, %v479_v39 }
 0x75e   :  { %v488_v45 = vsel %vm485_vm12, %v487_v43, %v483_v42 }
 0x75f   :  { %v503_v50 = vsub.f32 1.0, %v488_v45  ;;  %v511_v53 = vmul.f32 %v509_v51, %v488_v45 }
 0x79d   :  { %v494_v44 = vpop.permute.xlu2 %493 }
 0x79e   :  { %v496_v46 = vmul.f32 %v494_v44, %v488_v45 }
 0x7a0   :  { %498 = vrot.lane.b32.xlu0 %v496_v46, %s1228_s15 }
 0x812   :  { %v499_v47 = vpop.permute.xlu0 %498 }
 0x813   :  { %v501_v48 = vadd.f32 %v499_v47, %v1356_v30 }
 0x815   :  { %1052 = vtanh.f32 %v501_v48 }
 0x81b   :  { %v1053_v49 = vpop.eup %1052 }
 0x81c   :  { %505 = vrot.lane.b32.xlu1 %v1053_v49, %s1229_s4 }
 0x88e   :  { %v506_v52 = vpop.permute.xlu1 %505 }
 0x88f   :  { %v508_v54 = vmul.f32 %v506_v52, %v503_v50 }
 0x891   :  { %v1387_v55 = vadd.f32 %v511_v53, %v508_v54 }
 0x893   :  { %v519_v56 = vrot.slane %v1387_v55, 4  ;;  %v586_v18 = vrot.slane %v1387_v55, 6 }
 0x895   :  { %520 = vrot.lane.b32.xlu2 %v519_v56, %s1229_s4 }
 0x8ef   :  { %v521_v57 = vpop.permute.xlu2 %520 }
 0x8f0   :  { %1000 = vmatmul.msk.f32.vlgmr.msrb.gmra.mxu3 %vm221_vm14, %v521_v57 }
 0x973   :  { %v541_v58 = vpop.f32.mrf.mxu3 }
 0x974   :  { %v567_v59 = vadd.f32 %v541_v58, %v1351_v26  ;;  %v545_v61 = vrot.slane %v541_v58, 2 }
 0x976   :  { %v569_v60 = vrot.slane %v567_v59, 2  ;;  %v547_v62 = vadd.f32 %v545_v61, %v1356_v30 }
 0x978   :  { %570 = vrot.lane.b32.xlu0 %v569_v60, %s1228_s15  ;;  %v1001_v63 = vmul.f32 -1.442695, %v547_v62 }
 0x97a   :  { %1054 = vpow2.f32 %v1001_v63 }
 0x980   :  { %v1055_v0 = vpop.eup %1054 }
 0x981   :  { %v551_v1 = vadd.f32 1.0, %v1055_v0 }
 0x983   :  { %1056 = vrcp.f32 %v551_v1  ;;  %v563_v7 = vand.u32 2147483648, %v551_v1  ;;  %vm557_vm15 = vweird.f32 %v551_v1  ;;  %v561_v8 = vand.u32 2147483647, %v551_v1 }
 0x985   :  { %v564_v10 = vor.u32 1.1754944e-38, %v563_v7  ;;  %vm562_vm1 = vcmp.eq.f32.partialorder %v561_v8, 8.507059e+37 }
 0x989   :  { %v1057_v2 = vpop.eup %1056 }
 0x98a   :  { %v553_v3 = vmul.f32 %v1057_v2, %v551_v1  ;;  %vm558_vm13 = vweird.f32 %v1057_v2 }
 0x98b   :  { %vm559_vm0 = vmor %vm557_vm15, %vm558_vm13 }
 0x98c   :  { %v554_v4 = vsub.f32 1.0, %v553_v3 }
 0x98e   :  { %v555_v5 = vmul.f32 %v1057_v2, %v554_v4 }
 0x990   :  { %v556_v6 = vadd.f32 %v1057_v2, %v555_v5 }
 0x992   :  { %v560_v9 = vsel %vm559_vm0, %v1057_v2, %v556_v6 }
 0x993   :  { %v565_v12 = vsel %vm562_vm1, %v564_v10, %v560_v9 }
 0x994   :  { %v580_v17 = vsub.f32 1.0, %v565_v12  ;;  %v588_v20 = vmul.f32 %v586_v18, %v565_v12 }
 0x9ea   :  { %v571_v11 = vpop.permute.xlu0 %570 }
 0x9eb   :  { %v573_v13 = vmul.f32 %v571_v11, %v565_v12 }
 0x9ed   :  { %575 = vrot.lane.b32.xlu1 %v573_v13, %s1228_s15 }
 0xa5f   :  { %v576_v14 = vpop.permute.xlu1 %575 }
 0xa60   :  { %v578_v15 = vadd.f32 %v576_v14, %v1356_v30 }
 0xa62   :  { %1058 = vtanh.f32 %v578_v15 }
 0xa68   :  { %v1059_v16 = vpop.eup %1058 }
 0xa69   :  { %582 = vrot.lane.b32.xlu2 %v1059_v16, %s1229_s4 }
 0xac3   :  { %v583_v19 = vpop.permute.xlu2 %582 }
 0xac4   :  { %v585_v22 = vmul.f32 %v583_v19, %v580_v17 }
 0xac6   :  { %v1399_v23 = vadd.f32 %v588_v20, %v585_v22 }
 0xac8   :  { %v596_v24 = vrot.slane %v1399_v23, 6 }
 0xaca   :  { %597 = vrot.lane.b32.xlu0 %v596_v24, %s1229_s4 }
 0xb3c   :  { %v598_v27 = vpop.permute.xlu0 %597 }
 0xb3d   :  { %1002 = vmatmul.msk.f32.vlgmr.msra.gmra.mxu2 %vm221_vm14, %v598_v27 }
 0xbc0   :  { %v618_v30 = vpop.f32.mrf.mxu2 }
 0xbc1   :  { %v641_v28 = vadd.f32 %v618_v30, %v1351_v26  ;;  %v621_v29 = vadd.f32 %v618_v30, %v1349_v25 }
 0xbc3   :  { %643 = vrot.lane.b32.xlu1 %v641_v28, %s1228_s15  ;;  %v1003_v31 = vmul.f32 -1.442695, %v621_v29 }
 0xbc5   :  { %1060 = vpow2.f32 %v1003_v31 }
 0xbcb   :  { %v1061_v32 = vpop.eup %1060 }
 0xbcc   :  { %v625_v33 = vadd.f32 1.0, %v1061_v32 }
 0xbce   :  { %1062 = vrcp.f32 %v625_v33  ;;  %v637_v39 = vand.u32 2147483648, %v625_v33  ;;  %vm631_vm3 = vweird.f32 %v625_v33  ;;  %v635_v40 = vand.u32 2147483647, %v625_v33 }
 0xbd0   :  { %v638_v42 = vor.u32 1.1754944e-38, %v637_v39  ;;  %vm636_vm6 = vcmp.eq.f32.partialorder %v635_v40, 8.507059e+37 }
 0xbd4   :  { %v1063_v34 = vpop.eup %1062 }
 0xbd5   :  { %v627_v35 = vmul.f32 %v1063_v34, %v625_v33  ;;  %vm632_vm2 = vweird.f32 %v1063_v34 }
 0xbd6   :  { %vm633_vm5 = vmor %vm631_vm3, %vm632_vm2  ;;  %vm440_vm3 = vcmask 257026  }
 0xbd7   :  { %v628_v36 = vsub.f32 1.0, %v627_v35 }
 0xbd9   :  { %v629_v37 = vmul.f32 %v1063_v34, %v628_v36 }
 0xbdb   :  { %v630_v38 = vadd.f32 %v1063_v34, %v629_v37 }
 0xbdd   :  { %v634_v41 = vsel %vm633_vm5, %v1063_v34, %v630_v38  ;;  %vm517_vm5 = vcmask 259076  }
 0xbde   :  { %v639_v44 = vsel %vm636_vm6, %v638_v42, %v634_v41  ;;  %vm594_vm6 = vcmask 261126  }
 0xbdf   :  { %v653_v49 = vsub.f32 1.0, %v639_v44  ;;  %v660_v51 = vmul.f32 %v639_v44, %v596_v24 }
 0xc35   :  { %v644_v43 = vpop.permute.xlu1 %643 }
 0xc36   :  { %v646_v45 = vmul.f32 %v644_v43, %v639_v44 }
 0xc38   :  { %648 = vrot.lane.b32.xlu2 %v646_v45, %s1228_s15 }
 0xc92   :  { %v649_v46 = vpop.permute.xlu2 %648 }
 0xc93   :  { %v651_v47 = vadd.f32 %v649_v46, %v1349_v25 }
 0xc95   :  { %1064 = vtanh.f32 %v651_v47 }
 0xc9b   :  { %v1065_v48 = vpop.eup %1064 }
 0xc9c   :  { %655 = vrot.lane.b32.xlu0 %v1065_v48, %s1229_s4 }
 0xd0e   :  { %v656_v50 = vpop.permute.xlu0 %655 }
 0xd0f   :  { %v658_v52 = vmul.f32 %v656_v50, %v653_v49 }
 0xd11   :  { %v661_v53 = vadd.f32 %v660_v51, %v658_v52 }
 0xd13   :  { %663 = vrot.lane.b32.xlu1 %v661_v53, %s1229_s4  ;;  %v731_v8 = vrot.slane %v661_v53, 6 }
 0xd85   :  { %v664_v54 = vpop.permute.xlu1 %663 }
 0xd86   :  { %666 = vst.msk [vmem:[#allocation2 + $0x8] sm:$0x3] %vm366_vm4, %v664_v54  ;;  %1004 = vmatmul.msk.f32.vlgmr.msra.gmra.mxu3 %vm221_vm14, %v664_v54 }
 0xe09   :  { %v686_v56 = vpop.f32.mrf.mxu3 }
 0xe0a   :  { %v690_v57 = vrot.slane %v686_v56, 6  ;;  %v712_v58 = vadd.f32 %v686_v56, %v1351_v26 }
 0xe0c   :  { %v692_v59 = vadd.f32 %v690_v57, %v1349_v25  ;;  %v714_v60 = vrot.slane %v712_v58, 6 }
 0xe0e   :  { %v1005_v61 = vmul.f32 -1.442695, %v692_v59  ;;  %715 = vrot.lane.b32.xlu2 %v714_v60, %s1228_s15 }
 0xe10   :  { %1066 = vpow2.f32 %v1005_v61 }
 0xe16   :  { %v1067_v62 = vpop.eup %1066 }
 0xe17   :  { %v696_v63 = vadd.f32 1.0, %v1067_v62 }
 0xe19   :  { %1068 = vrcp.f32 %v696_v63  ;;  %v708_v3 = vand.u32 2147483648, %v696_v63  ;;  %v706_v5 = vand.u32 2147483647, %v696_v63  ;;  %vm702_vm7 = vweird.f32 %v696_v63 }
 0xe1b   :  { %v709_v7 = vor.u32 1.1754944e-38, %v708_v3  ;;  %vm707_vm9 = vcmp.eq.f32.partialorder %v706_v5, 8.507059e+37 }
 0xe1f   :  { %v1069_v0 = vpop.eup %1068 }
 0xe20   :  { %v698_v1 = vmul.f32 %v1069_v0, %v696_v63  ;;  %vm703_vm4 = vweird.f32 %v1069_v0 }
 0xe21   :  { %vm704_vm8 = vmor %vm702_vm7, %vm703_vm4 }
 0xe22   :  { %v699_v2 = vsub.f32 1.0, %v698_v1 }
 0xe24   :  { %v700_v4 = vmul.f32 %v1069_v0, %v699_v2 }
 0xe26   :  { %v701_v6 = vadd.f32 %v1069_v0, %v700_v4 }
 0xe28   :  { %v705_v9 = vsel %vm704_vm8, %v1069_v0, %v701_v6 }
 0xe29   :  { %v710_v10 = vsel %vm707_vm9, %v709_v7, %v705_v9 }
 0xe2a   :  { %v733_v11 = vmul.f32 %v731_v8, %v710_v10  ;;  %v725_v17 = vsub.f32 1.0, %v710_v10 }
 0xe68   :  { %v716_v12 = vpop.permute.xlu2 %715 }
 0xe69   :  { %v718_v13 = vmul.f32 %v716_v12, %v710_v10 }
 0xe6b   :  { %720 = vrot.lane.b32.xlu0 %v718_v13, %s1228_s15 }
 0xedd   :  { %v721_v14 = vpop.permute.xlu0 %720 }
 0xede   :  { %v723_v15 = vadd.f32 %v721_v14, %v1349_v25 }
 0xee0   :  { %1070 = vtanh.f32 %v723_v15 }
 0xee6   :  { %v1071_v16 = vpop.eup %1070 }
 0xee7   :  { %727 = vrot.lane.b32.xlu1 %v1071_v16, %s1229_s4 }
 0xf59   :  { %v728_v18 = vpop.permute.xlu1 %727 }
 0xf5a   :  { %v730_v19 = vmul.f32 %v728_v18, %v725_v17 }
 0xf5c   :  { %v734_v20 = vadd.f32 %v733_v11, %v730_v19 }
 0xf5e   :  { %v740_v22 = vrot.slane %v734_v20, 2  ;;  %v807_v51 = vrot.slane %v734_v20, 6 }
 0xf60   :  { %741 = vrot.lane.b32.xlu2 %v740_v22, %s1229_s4  ;;  %v105_v22 = vld [vmem:[#allocation8 + $0x8] sm:$0xff] }
 0xfba   :  { %v742_v24 = vpop.permute.xlu2 %741 }
 0xfbb   :  { %1006 = vmatmul.msk.f32.vlgmr.msrb.gmra.mxu0 %vm221_vm14, %v742_v24  ;;  %v104_v24 = vld [vmem:[#allocation8] sm:$0xff] }
0x1038   :  { %v762_v27 = vpop.f32.mrf.mxu0 }
0x1039   :  { %v788_v30 = vadd.f32 %v762_v27, %v1351_v26  ;;  %v766_v29 = vrot.slane %v762_v27, 4 }
0x103b   :  { %v790_v28 = vrot.slane %v788_v30, 4  ;;  %v768_v31 = vadd.f32 %v766_v29, %v1349_v25 }
0x103d   :  { %791 = vrot.lane.b32.xlu0 %v790_v28, %s1228_s15  ;;  %v1007_v32 = vmul.f32 -1.442695, %v768_v31 }
0x103f   :  { %1072 = vpow2.f32 %v1007_v32 }
0x1045   :  { %v1073_v33 = vpop.eup %1072 }
0x1046   :  { %v772_v34 = vadd.f32 1.0, %v1073_v33 }
0x1048   :  { %1074 = vrcp.f32 %v772_v34  ;;  %v784_v40 = vand.u32 2147483648, %v772_v34  ;;  %vm778_vm11 = vweird.f32 %v772_v34  ;;  %v782_v41 = vand.u32 2147483647, %v772_v34 }
0x104a   :  { %v785_v43 = vor.u32 1.1754944e-38, %v784_v40  ;;  %vm783_vm13 = vcmp.eq.f32.partialorder %v782_v41, 8.507059e+37 }
0x104e   :  { %v1075_v35 = vpop.eup %1074 }
0x104f   :  { %v774_v36 = vmul.f32 %v1075_v35, %v772_v34  ;;  %vm779_vm10 = vweird.f32 %v1075_v35 }
0x1050   :  { %vm780_vm12 = vmor %vm778_vm11, %vm779_vm10 }
0x1051   :  { %v775_v37 = vsub.f32 1.0, %v774_v36 }
0x1053   :  { %v776_v38 = vmul.f32 %v1075_v35, %v775_v37 }
0x1055   :  { %v777_v39 = vadd.f32 %v1075_v35, %v776_v38 }
0x1057   :  { %v781_v42 = vsel %vm780_vm12, %v1075_v35, %v777_v39  ;;  %v1035_v35 = vld [vmem:[#allocation8 + $0x20] ss:$0 sm:$0xff] }
0x1058   :  { %v786_v45 = vsel %vm783_vm13, %v785_v43, %v781_v42 }
0x1059   :  { %v801_v50 = vsub.f32 1.0, %v786_v45  ;;  %v809_v53 = vmul.f32 %v807_v51, %v786_v45 }
0x10af   :  { %v792_v44 = vpop.permute.xlu0 %791 }
0x10b0   :  { %v794_v46 = vmul.f32 %v792_v44, %v786_v45 }
0x10b2   :  { %796 = vrot.lane.b32.xlu1 %v794_v46, %s1228_s15 }
0x1124   :  { %v797_v47 = vpop.permute.xlu1 %796 }
0x1125   :  { %v799_v48 = vadd.f32 %v797_v47, %v1349_v25 }
0x1127   :  { %1076 = vtanh.f32 %v799_v48 }
0x112d   :  { %v1077_v49 = vpop.eup %1076 }
0x112e   :  { %803 = vrot.lane.b32.xlu2 %v1077_v49, %s1229_s4 }
0x1188   :  { %v804_v52 = vpop.permute.xlu2 %803 }
0x1189   :  { %v806_v54 = vmul.f32 %v804_v52, %v801_v50 }
0x118b   :  { %v1427_v56 = vadd.f32 %v809_v53, %v806_v54 }
0x118d   :  { %v816_v57 = vrot.slane %v1427_v56, 4  ;;  %v883_v27 = vrot.slane %v1427_v56, 6 }
0x118f   :  { %817 = vrot.lane.b32.xlu0 %v816_v57, %s1229_s4 }
0x1201   :  { %v818_v58 = vpop.permute.xlu0 %817 }
0x1202   :  { %1008 = vmatmul.msk.f32.vlgmr.msrb.gmra.mxu1 %vm221_vm14, %v818_v58 }
0x127f   :  { %v838_v59 = vpop.f32.mrf.mxu1 }
0x1280   :  { %v864_v60 = vadd.f32 %v838_v59, %v1351_v26  ;;  %v842_v62 = vrot.slane %v838_v59, 2 }
0x1282   :  { %v866_v61 = vrot.slane %v864_v60, 2  ;;  %v844_v63 = vadd.f32 %v842_v62, %v1349_v25 }
0x1284   :  { %867 = vrot.lane.b32.xlu1 %v866_v61, %s1228_s15  ;;  %v1009_v0 = vmul.f32 -1.442695, %v844_v63 }
0x1286   :  { %1078 = vpow2.f32 %v1009_v0 }
0x128c   :  { %437 = vrot.lane.b32.xlu1 %v1375_v21, %s1229_s4  ;;  %v1079_v1 = vpop.eup %1078 }
0x128d   :  { %v848_v2 = vadd.f32 1.0, %v1079_v1 }
0x128f   :  { %1080 = vrcp.f32 %v848_v2  ;;  %v860_v7 = vand.u32 2147483648, %v848_v2  ;;  %vm854_vm0 = vweird.f32 %v848_v2  ;;  %v858_v8 = vand.u32 2147483647, %v848_v2 }
0x1291   :  { %v861_v9 = vor.u32 1.1754944e-38, %v860_v7  ;;  %vm859_vm2 = vcmp.eq.f32.partialorder %v858_v8, 8.507059e+37 }
0x1294   :  { %736 = vrot.lane.b32.xlu1 %v734_v20, %s1229_s4  ;;  %v106_v20 = vld [vmem:[#allocation8 + $0x10] sm:$0xff] }
0x1295   :  { %v1081_v3 = vpop.eup %1080 }
0x1296   :  { %v850_v4 = vmul.f32 %v1081_v3, %v848_v2  ;;  %vm855_vm15 = vweird.f32 %v1081_v3 }
0x1297   :  { %vm856_vm1 = vmor %vm854_vm0, %vm855_vm15 }
0x1298   :  { %v851_v5 = vsub.f32 1.0, %v850_v4 }
0x129a   :  { %v852_v26 = vmul.f32 %v1081_v3, %v851_v5 }
0x129c   :  { %v853_v6 = vadd.f32 %v1081_v3, %v852_v26 }
0x129e   :  { %v857_v21 = vsel %vm856_vm1, %v1081_v3, %v853_v6 }
0x129f   :  { %v862_v11 = vsel %vm859_vm2, %v861_v9, %v857_v21 }
0x12a0   :  { %v885_v28 = vmul.f32 %v883_v27, %v862_v11 }
0x12f6   :  { %v868_v10 = vpop.permute.xlu1 %867 }
0x12f7   :  { %v870_v12 = vmul.f32 %v868_v10, %v862_v11 }
0x12f9   :  { %872 = vrot.lane.b32.xlu2 %v870_v12, %s1228_s15 }
0x12fe   :  { %v438_v13 = vpop.permute.xlu1 %437 }
0x12ff   :  { %441 = vst.msk [vmem:[#allocation2] sm:$0xc] %vm440_vm3, %v438_v13 }
0x1301   :  { %514 = vrot.lane.b32.xlu2 %v1387_v55, %s1229_s4  ;;  %v107_v55 = vld [vmem:[#allocation8 + $0x18] sm:$0xff] }
0x1302   :  { %914 = vmatpush.msrb.mxu2 %v107_v55 }
0x1304   :  { %915 = vmatpush.msrb.mxu2 %v106_v20 }
0x1306   :  { %v737_v14 = vpop.permute.xlu1 %736  ;;  %916 = vmatpush.msrb.mxu2 %v105_v22 }
0x1307   :  { %739 = vst.msk [vmem:[#allocation2 + $0x8] sm:$0xc] %vm440_vm3, %v737_v14 }
0x1308   :  { %917 = vmatpush.msrb.mxu2 %v104_v24 }
0x1309   :  { %812 = vrot.lane.b32.xlu2 %v1427_v56, %s1229_s4 }
0x1353   :  { %v873_v15 = vpop.permute.xlu2 %872 }
0x1354   :  { %v875_v16 = vadd.f32 %v873_v15, %v1349_v25  ;;  %v877_v25 = vsub.f32 1.0, %v862_v11 }
0x1356   :  { %1082 = vtanh.f32 %v875_v16 }
0x135b   :  { %v515_v17 = vpop.permute.xlu2 %514 }
0x135c   :  { %v1083_v18 = vpop.eup %1082  ;;  %518 = vst.msk [vmem:[#allocation2] sm:$0x30] %vm517_vm5, %v515_v17 }
0x135d   :  { %879 = vrot.lane.b32.xlu0 %v1083_v18, %s1229_s4 }
0x1363   :  { %v813_v19 = vpop.permute.xlu2 %812 }
0x1364   :  { %815 = vst.msk [vmem:[#allocation2 + $0x8] sm:$0x30] %vm517_vm5, %v813_v19 }
0x1365   :  { %591 = vrot.lane.b32.xlu0 %v1399_v23, %s1229_s4 }
0x13cf   :  { %v880_v30 = vpop.permute.xlu0 %879 }
0x13d0   :  { %v882_v29 = vmul.f32 %v880_v30, %v877_v25 }
0x13d2   :  { %v886_v31 = vadd.f32 %v885_v28, %v882_v29 }
0x13d4   :  { %888 = vrot.lane.b32.xlu0 %v886_v31, %s1229_s4 }
0x13d7   :  { %v592_v32 = vpop.permute.xlu0 %591 }
0x13d8   :  { %595 = vst.msk [vmem:[#allocation2] sm:$0xc0] %vm594_vm6, %v592_v32 }
0x13df   :  { %v893_v23 = vld [vmem:[#allocation2] sm:$0xff] }
0x13e0   :  { %1010 = vmatmul.msk.f32.vlgmr.msrb.gmra.mxu2 %vm221_vm14, %v893_v23 }
0x1446   :  { %v889_v33 = vpop.permute.xlu0 %888 }
0x1447   :  { %891 = vst.msk [vmem:[#allocation2 + $0x8] sm:$0xc0] %vm594_vm6, %v889_v33 }
0x1448   :  { %892 = vst.msk [vmem:[#allocation10 - $0x6] sm:$0xc0] %vm594_vm6, %v889_v33 }
0x1449   :  { %972 = dma.vmem_to_hbm [thread:$0]  %s968_s19, 32, %s970_s22, [#allocation11]  }
0x144e   :  { %v894_v34 = vld [vmem:[#allocation2 + $0x8] sm:$0xff] }
0x144f   :  { %1011 = vmatmul.msk.f32.gmra.mxu2 %vm221_vm14, %v894_v34 }
0x1463   :  { %v919_v36 = vpop.f32.mrf.mxu2 }
0x1464   :  { %v920_v37 = vadd.f32 %v1035_v35, %v919_v36 }
0x1466   :  { %925 = vmax.xlane.f32.xlu1 %v920_v37 }
0x14d2   :  { %v922_v38 = vpop.f32.mrf.mxu2 }
0x14d3   :  { %v923_v39 = vadd.f32 %v1035_v35, %v922_v38 }
0x14d5   :  { %927 = vmax.xlane.f32.xlu2 %v923_v39 }
0x14d9   :  { %v926_v40 = vpop.xlane.xlu1 %925 }
0x14da   :  { %v929_v41 = vsub.f32 %v920_v37, %v926_v40 }
0x14dc   :  { %v931_v42 = vmul.f32 1.442695, %v929_v41 }
0x14de   :  { %1084 = vpow2.f32 %v931_v42 }
0x14e4   :  { %v1085_v43 = vpop.eup %1084 }
0x14e5   :  { %935 = vadd.xlane.f32.xlu0 %v1085_v43 }
0x1548   :  { %v928_v44 = vpop.xlane.xlu2 %927 }
0x1549   :  { %v930_v45 = vsub.f32 %v923_v39, %v928_v44 }
0x154b   :  { %v933_v46 = vmul.f32 1.442695, %v930_v45 }
0x154d   :  { %1086 = vpow2.f32 %v933_v46 }
0x1553   :  { %v1087_v47 = vpop.eup %1086 }
0x1554   :  { %937 = vadd.xlane.f32.xlu2 %v1087_v47 }
0x1558   :  { %v936_v48 = vpop.xlane.xlu0 %935 }
0x1559   :  { %1088 = vlog2.f32 %v936_v48 }
0x155f   :  { %v1089_v49 = vpop.eup %1088 }
0x1560   :  { %v940_v50 = vmul.f32 0.6931472, %v1089_v49 }
0x1562   :  { %v943_v51 = vadd.f32 %v940_v50, %v926_v40 }
0x1564   :  { %v945_v52 = vsub.f32 %v920_v37, %v943_v51 }
0x1566   :  { %947 = vst [vmem:[#allocation9] sm:$0xff] %v945_v52 }
0x15c7   :  { %v938_v53 = vpop.xlane.xlu2 %937 }
0x15c8   :  { %1090 = vlog2.f32 %v938_v53 }
0x15ce   :  { %v1091_v54 = vpop.eup %1090 }
0x15cf   :  { %v942_v56 = vmul.f32 0.6931472, %v1091_v54 }
0x15d1   :  { %v944_v57 = vadd.f32 %v942_v56, %v928_v44 }
0x15d3   :  { %v946_v58 = vsub.f32 %v923_v39, %v944_v57 }
0x15d5   :  { %948 = vst [vmem:[#allocation9 + $0x8] sm:$0xff] %v946_v58 }
0x15d6   :  { %961 = dma.vmem_to_hbm [thread:$0]  %s954_s24, 256, %s956_s6, [#allocation5], %s1221_s29, %s1221_s29, %s1222_s30  }
0x15d7   :  { %1216 = dma.done.wait [#allocation5], 256  }
0x15d8   :  { %1217 = vsyncadd [#allocation5], 4294967040 }
0x15d9   :  { %1218 = dma.done.wait [#allocation11], 32  }
0x15da   :  { %1219 = vsyncadd [#allocation11], 4294967264 }
0x15db   :  { %981 = vsyncpa [#allocation4], 1 }
0x15dc   :  { %982 = vsyncpa [#allocation7], 1 }
0x15dd   :  { %983 = vsyncpa [#allocation5], 1 }
0x15de   :  { %984 = vsyncpa [#allocation11], 1 }

</bundles_post_ra>
